<compile_context>
chip_gen: v6e
topology: v6e:2x2x1
jax: 0.10.0
libtpu: 0.0.40
codegen_flags: <defaults>
</compile_context>

<pallas_src>
import functools

import jax
import jax.numpy as jnp
from jax.experimental import pallas as pl
from jax.experimental.pallas import tpu as pltpu


# ---------------------------------------------------------------------------
# Pallas kernels
# ---------------------------------------------------------------------------

def _linear_bias_kernel(x_ref, w_ref, b_ref, o_ref):
    # vis_proj: o = x @ w + b   (w is bf16, fp32 accumulation)
    o_ref[...] = (
        jnp.dot(x_ref[...].astype(jnp.bfloat16), w_ref[...],
                preferred_element_type=jnp.float32)
        + b_ref[...]
    )


def _rmsnorm_qkv_kernel(x_ref, w_ref, wqkv_ref, o_ref, *, eps):
    # Fused: LLaMA RMSNorm + QKV projection (wq|wk|wv concatenated).
    x = x_ref[...]                                            # [TM, H] fp32
    var = jnp.mean(x * x, axis=-1, keepdims=True)
    h = (x * jax.lax.rsqrt(var + eps)) * w_ref[...]
    o_ref[...] = jnp.dot(h.astype(jnp.bfloat16), wqkv_ref[...],
                         preferred_element_type=jnp.float32)  # [TM, 3H]


def _attn_wo_kernel(qkv_ref, x_ref, bias_ref, cos_ref, sin_ref, wo_ref, o_ref,
                    *, num_heads, head_dim, hidden):
    # Fused: per-head RoPE + causal attention + output projection + residual add.
    # qkv_ref: [T, 3H] for one batch, x_ref: [T, H] residual, bias: [1, T, T].
    d2 = head_dim // 2
    ch = cos_ref[...]                                         # [T, Dh/2]
    sh = sin_ref[...]
    bias = bias_ref[0]                                        # [T, T]
    acc = x_ref[...]                                          # residual, fp32 [T, H]

    for h in range(num_heads):                                # static unroll
        qh = qkv_ref[:, h * head_dim:(h + 1) * head_dim]                     # [T, Dh]
        kh = qkv_ref[:, hidden + h * head_dim: hidden + (h + 1) * head_dim]
        vh = qkv_ref[:, 2 * hidden + h * head_dim: 2 * hidden + (h + 1) * head_dim]

        # RoPE via half-split (no concatenate / roll needed):
        #   rope(x) = [x1*c - x2*s , x2*c + x1*s]
        q1, q2 = qh[:, :d2], qh[:, d2:]
        k1, k2 = kh[:, :d2], kh[:, d2:]
        rq1, rq2 = q1 * ch - q2 * sh, q2 * ch + q1 * sh
        rk1, rk2 = k1 * ch - k2 * sh, k2 * ch + k1 * sh

        # scores = rope(q) . rope(k)^T  (1/sqrt(Dh) already baked into wq)
        dn = (((1,), (1,)), ((), ()))
        s = (jax.lax.dot_general(rq1, rk1, dn, preferred_element_type=jnp.float32)
             + jax.lax.dot_general(rq2, rk2, dn, preferred_element_type=jnp.float32)
             + bias)                                           # [T, T]

        m = jnp.max(s, axis=-1, keepdims=True)
        p = jnp.exp(s - m)
        p = p * pl.reciprocal(jnp.sum(p, axis=-1, keepdims=True), approx=True)

        attn_h = jnp.dot(p, vh, preferred_element_type=jnp.float32)         # [T, Dh]
        # fold output projection per head: attn_h @ Wo[h*Dh:(h+1)*Dh, :]
        acc = acc + jnp.dot(attn_h.astype(jnp.bfloat16),
                            wo_ref[h * head_dim:(h + 1) * head_dim, :],
                            preferred_element_type=jnp.float32)
    o_ref[...] = acc                                           # [T, H] lane-dense


def _rmsnorm_mlp_kernel(x_ref, w_ref, wgu_ref, wd_ref, o_ref, *, eps, inter):
    # Fused: RMSNorm + SwiGLU (wg|wu fused) + down projection + residual add.
    x = x_ref[...]                                             # [TM, H] fp32
    var = jnp.mean(x * x, axis=-1, keepdims=True)
    h = ((x * jax.lax.rsqrt(var + eps)) * w_ref[...]).astype(jnp.bfloat16)
    gu = jnp.dot(h, wgu_ref[...], preferred_element_type=jnp.float32)       # [TM, 2I]
    g = gu[:, :inter]
    u = gu[:, inter:]
    act = (g * jax.nn.sigmoid(g)) * u                          # silu*gate in fp32
    o_ref[...] = x + jnp.dot(act.astype(jnp.bfloat16), wd_ref[...],
                             preferred_element_type=jnp.float32)


def _lmhead_ce_kernel(x_ref, w_ref, wlm_ref, tgt_ref, o_ref,
                      h_sc, m_sc, l_sc, t_sc, *, eps, tile_v, denom):
    # Fused: final RMSNorm + lm_head + mean cross-entropy, streamed over vocab tiles
    # with an online logsumexp; target logit picked by integer compare (no one-hot).
    j = pl.program_id(0)

    @pl.when(j == 0)
    def _init():
        x = x_ref[...]
        var = jnp.mean(x * x, axis=-1, keepdims=True)
        h_sc[...] = (x * jax.lax.rsqrt(var + eps)) * w_ref[...]
        m_sc[...] = jnp.full(m_sc.shape, -jnp.inf, m_sc.dtype)
        l_sc[...] = jnp.zeros(l_sc.shape, l_sc.dtype)
        t_sc[...] = jnp.zeros(t_sc.shape, t_sc.dtype)

    logits = jnp.dot(h_sc[...].astype(jnp.bfloat16), wlm_ref[...],
                     preferred_element_type=jnp.float32)       # [N, TV]

    col = jax.lax.broadcasted_iota(jnp.int32, logits.shape, 1) + j * tile_v
    hit = col == tgt_ref[...]                                  # [N, TV] vs [N, 1]
    t_sc[...] += jnp.sum(jnp.where(hit, logits, 0.0), axis=-1, keepdims=True)

    m_new = jnp.maximum(m_sc[...], jnp.max(logits, axis=-1, keepdims=True))
    l_sc[...] = (l_sc[...] * jnp.exp(m_sc[...] - m_new)
                 + jnp.sum(jnp.exp(logits - m_new), axis=-1, keepdims=True))
    m_sc[...] = m_new

    @pl.when(j == pl.num_programs(0) - 1)
    def _finalize():
        lse = m_sc[...] + jnp.log(l_sc[...])
        o_ref[...] = jnp.sum(lse - t_sc[...], keepdims=True) / denom


# ---------------------------------------------------------------------------
# Pallas wrappers
# ---------------------------------------------------------------------------

def vis_proj(x, w_bf16, b):
    B = x.shape[0]
    H = w_bf16.shape[1]
    vm = pl.BlockSpec(memory_space=pltpu.MemorySpace.VMEM)
    return pl.pallas_call(
        _linear_bias_kernel,
        out_shape=jax.ShapeDtypeStruct((B, H), jnp.float32),
        in_specs=[vm, vm, vm],
        out_specs=vm,
    )(x.astype(jnp.float32), w_bf16, b)


def rmsnorm_qkv(x2d, norm_w, wqkv, eps=1e-6):
    M, H = x2d.shape
    N3 = wqkv.shape[1]
    TM = 8 if M % 8 == 0 else M
    return pl.pallas_call(
        functools.partial(_rmsnorm_qkv_kernel, eps=eps),
        out_shape=jax.ShapeDtypeStruct((M, N3), jnp.float32),
        grid=(M // TM,),
        in_specs=[pl.BlockSpec((TM, H), lambda i: (i, 0)),
                  pl.BlockSpec((1, H), lambda i: (0, 0)),
                  pl.BlockSpec((H, N3), lambda i: (0, 0))],
        out_specs=pl.BlockSpec((TM, N3), lambda i: (i, 0)),
        compiler_params=pltpu.CompilerParams(dimension_semantics=("parallel",)),
    )(x2d, norm_w, wqkv)


def attention_wo_residual(qkv, x2d, bias, cos_h, sin_h, wo, *,
                          batch, seq, heads, head_dim):
    M, H = x2d.shape
    T = seq
    d2 = head_dim // 2
    return pl.pallas_call(
        functools.partial(_attn_wo_kernel, num_heads=heads,
                          head_dim=head_dim, hidden=H),
        out_shape=jax.ShapeDtypeStruct((M, H), jnp.float32),
        grid=(batch,),
        in_specs=[pl.BlockSpec((T, 3 * H), lambda b: (b, 0)),
                  pl.BlockSpec((T, H), lambda b: (b, 0)),
                  pl.BlockSpec((1, T, T), lambda b: (b, 0, 0)),
                  pl.BlockSpec((T, d2), lambda b: (0, 0)),
                  pl.BlockSpec((T, d2), lambda b: (0, 0)),
                  pl.BlockSpec((H, H), lambda b: (0, 0))],
        out_specs=pl.BlockSpec((T, H), lambda b: (b, 0)),
        compiler_params=pltpu.CompilerParams(dimension_semantics=("parallel",)),
    )(qkv, x2d, bias, cos_h, sin_h, wo)


def rmsnorm_mlp_residual(x2d, norm_w, wgu, wd, eps=1e-6):
    M, H = x2d.shape
    I2 = wgu.shape[1]
    I = I2 // 2
    TM = 8 if M % 8 == 0 else M
    return pl.pallas_call(
        functools.partial(_rmsnorm_mlp_kernel, eps=eps, inter=I),
        out_shape=jax.ShapeDtypeStruct((M, H), jnp.float32),
        grid=(M // TM,),
        in_specs=[pl.BlockSpec((TM, H), lambda i: (i, 0)),
                  pl.BlockSpec((1, H), lambda i: (0, 0)),
                  pl.BlockSpec((H, I2), lambda i: (0, 0)),
                  pl.BlockSpec((I, H), lambda i: (0, 0))],
        out_specs=pl.BlockSpec((TM, H), lambda i: (i, 0)),
        compiler_params=pltpu.CompilerParams(dimension_semantics=("parallel",)),
    )(x2d, norm_w, wgu, wd)


def lmhead_ce(xp, norm_w, w_lm, targets, eps=1e-6):
    # final RMSNorm + lm_head + mean CE, vocab streamed in TV-wide tiles.
    N, H = xp.shape
    V = w_lm.shape[1]
    TV = 128 if V % 128 == 0 else V
    out = pl.pallas_call(
        functools.partial(_lmhead_ce_kernel, eps=eps, tile_v=TV, denom=float(N)),
        out_shape=jax.ShapeDtypeStruct((1, 1), jnp.float32),
        grid=(V // TV,),
        in_specs=[pl.BlockSpec((N, H), lambda j: (0, 0)),
                  pl.BlockSpec((1, H), lambda j: (0, 0)),
                  pl.BlockSpec((H, TV), lambda j: (0, j)),
                  pl.BlockSpec((N, 1), lambda j: (0, 0))],
        out_specs=pl.BlockSpec((1, 1), lambda j: (0, 0)),
        scratch_shapes=[pltpu.VMEM((N, H), jnp.float32),   # normalized hidden
                        pltpu.VMEM((N, 1), jnp.float32),   # running max
                        pltpu.VMEM((N, 1), jnp.float32),   # running sum(exp)
                        pltpu.VMEM((N, 1), jnp.float32)],  # target logit
        compiler_params=pltpu.CompilerParams(dimension_semantics=("arbitrary",)),
    )(xp, norm_w, w_lm, targets)
    return out[0, 0]


# ---------------------------------------------------------------------------
# Plain-JAX glue (mask build, RoPE tables, embedding gather)
# ---------------------------------------------------------------------------

def rope_cos_sin_half(seq_len, head_dim, base=10000.0):
    inv = 1.0 / (base ** (jnp.arange(0, head_dim, 2, dtype=jnp.float32) / head_dim))
    t = jnp.arange(seq_len, dtype=jnp.float32)
    freqs = jnp.outer(t, inv)                 # [T, Dh/2]
    return jnp.cos(freqs), jnp.sin(freqs)


def build_attn_bias(full_mask):
    # full_mask: [B, T] 1=keep, 0=pad  ->  additive bias [B, T, T] (NO head repeat).
    b, t = full_mask.shape
    causal = jnp.tril(jnp.ones((t, t), jnp.bool_))
    keep = causal[None, :, :] & (full_mask[:, None, :] > 0)
    return jnp.where(keep, 0.0, -1e9).astype(jnp.float32)


# ---------------------------------------------------------------------------
# EarthGPT forward
# ---------------------------------------------------------------------------

def earthgpt_forward(prep, cfg, visual_feat, input_ids, attention_mask):
    B = visual_feat.shape[0]
    S = input_ids.shape[1]
    H, Hh, Dh = cfg["hidden"], cfg["heads"], cfg["head_dim"]
    T = S + 1
    M = B * T

    # vis_proj (Linear with bias) -- Pallas kernel
    vis_emb = vis_proj(visual_feat, prep["vis_w"], prep["vis_b"])          # [B, H]

    # TODO(synk): embedding gather left to XLA (jnp.take); no Pallas gather needed here.
    tok_emb = jnp.take(prep["embed"], input_ids, axis=0)                   # [B, S, H]
    x = jnp.concatenate([vis_emb[:, None, :], tok_emb], axis=1)            # [B, T, H]
    x = x.reshape(M, H)                                                    # lane-dense slab

    full_mask = jnp.concatenate(
        [jnp.ones((B, 1), attention_mask.dtype), attention_mask], axis=1)  # [B, T]
    bias = build_attn_bias(full_mask)                                      # [B, T, T]
    cos_h, sin_h = rope_cos_sin_half(T, Dh)                                # [T, Dh/2]

    for L in prep["layers"]:
        qkv = rmsnorm_qkv(x, L["attn_norm"], L["wqkv"])                    # [M, 3H]
        x = attention_wo_residual(qkv, x, bias, cos_h, sin_h, L["wo"],
                                  batch=B, seq=T, heads=Hh, head_dim=Dh)   # [M, H]
        x = rmsnorm_mlp_residual(x, L["mlp_norm"], L["wgu"], L["wd"])      # [M, H]

    # Causal-LM loss with labels = input_ids: logits at positions 0..S-1 predict the
    # S language tokens (HF shift with a length-(S+1) sequence & length-S labels).
    # Note: HF labels here are raw input_ids (pad_token = eos_token, never -100), so
    # padded positions legitimately contribute to numerator & denominator.
    xp = x.reshape(B, T, H)[:, :S, :].reshape(B * S, H)
    targets = input_ids.reshape(B * S, 1).astype(jnp.int32)
    return lmhead_ce(xp, prep["final_norm"], prep["lm_head"], targets)


# ---------------------------------------------------------------------------
# Deterministic parameter init + one-time weight prep (fuse + bf16 cast)
# ---------------------------------------------------------------------------

def init_params(key, cfg):
    Dv, H, I, V = cfg["vis_dim"], cfg["hidden"], cfg["inter"], cfg["vocab"]

    def nrm(k, shape, scale=0.02):
        return scale * jax.random.normal(k, shape, jnp.float32)

    keys = iter(jax.random.split(key, 8 + 9 * cfg["layers"]))
    params = {
        "vis_w": nrm(next(keys), (Dv, H)),
        "vis_b": nrm(next(keys), (H,)),
        "embed": nrm(next(keys), (V, H)),
        "final_norm": jnp.ones((H,), jnp.float32),
        "lm_head": nrm(next(keys), (H, V)),
        "layers": [],
    }
    for _ in range(cfg["layers"]):
        params["layers"].append({
            "attn_norm": jnp.ones((H,), jnp.float32),
            "wq": nrm(next(keys), (H, H)),
            "wk": nrm(next(keys), (H, H)),
            "wv": nrm(next(keys), (H, H)),
            "wo": nrm(next(keys), (H, H)),
            "mlp_norm": jnp.ones((H,), jnp.float32),
            "wg": nrm(next(keys), (H, I)),
            "wu": nrm(next(keys), (H, I)),
            "wd": nrm(next(keys), (I, H)),
        })
    return params


def prepare_weights(params, cfg):
    # One-time: fuse QKV / gate-up, bake 1/sqrt(Dh) into wq, cast weights to bf16.
    scale = 1.0 / float(cfg["head_dim"]) ** 0.5
    prep = {
        "vis_w": params["vis_w"].astype(jnp.bfloat16),
        "vis_b": params["vis_b"].reshape(1, -1).astype(jnp.float32),
        "embed": params["embed"],                       # fp32 gather source
        "final_norm": params["final_norm"].reshape(1, -1).astype(jnp.float32),
        "lm_head": params["lm_head"].astype(jnp.bfloat16),
        "layers": [],
    }
    for L in params["layers"]:
        wqkv = jnp.concatenate([L["wq"] * scale, L["wk"], L["wv"]], axis=1)
        wgu = jnp.concatenate([L["wg"], L["wu"]], axis=1)
        prep["layers"].append({
            "attn_norm": L["attn_norm"].reshape(1, -1).astype(jnp.float32),
            "wqkv": wqkv.astype(jnp.bfloat16),
            "wo": L["wo"].astype(jnp.bfloat16),
            "mlp_norm": L["mlp_norm"].reshape(1, -1).astype(jnp.float32),
            "wgu": wgu.astype(jnp.bfloat16),
            "wd": L["wd"].astype(jnp.bfloat16),
        })
    return prep


if __name__ == "__main__":
    cfg = dict(vis_dim=64, hidden=128, heads=4, head_dim=32,
               inter=256, vocab=512, layers=2)
    B, S = 2, 7

    root = jax.random.PRNGKey(0)
    k_par, k_vis, k_ids = jax.random.split(root, 3)

    params = init_params(k_par, cfg)
    prep = prepare_weights(params, cfg)

    visual_feat = jax.random.normal(k_vis, (B, cfg["vis_dim"]), jnp.float32)

    # Synthetic stand-in for LlamaTokenizer(lang_instr): deterministic ids + mask
    # (left padding on batch element 0).
    input_ids = jax.random.randint(k_ids, (B, S), 0, cfg["vocab"], dtype=jnp.int32)
    attention_mask = jnp.ones((B, S), jnp.int32).at[0, 0].set(0)

    fwd = jax.jit(lambda p, vf, ids, am: earthgpt_forward(p, cfg, vf, ids, am))
    loss = jax.block_until_ready(fwd(prep, visual_feat, input_ids, attention_mask))

    assert loss.shape == () and bool(jnp.isfinite(loss))
    print("KERNEL_OK")
</pallas_src>

<mosaic_0001>
module attributes {stable_mosaic.version = 11 : i64} {
  func.func @_linear_bias_kernel(%arg0: memref<2x64xf32, #tpu.memory_space<vmem>>, %arg1: memref<64x128xbf16, #tpu.memory_space<vmem>>, %arg2: memref<1x128xf32, #tpu.memory_space<vmem>>, %arg3: memref<2x128xf32, #tpu.memory_space<vmem>>) attributes {dimension_semantics = [], scalar_prefetch = 0 : i64, scratch_operands = 0 : i64, tpu.core_type = #tpu.core_type<tc>} {
    %c0 = arith.constant 0 : index
    %c0_0 = arith.constant 0 : index
    %0 = vector.load %arg0[%c0, %c0_0] : memref<2x64xf32, #tpu.memory_space<vmem>>, vector<2x64xf32>
    %1 = arith.truncf %0 : vector<2x64xf32> to vector<2x64xbf16>
    %c0_1 = arith.constant 0 : index
    %c0_2 = arith.constant 0 : index
    %2 = vector.load %arg1[%c0_1, %c0_2] : memref<64x128xbf16, #tpu.memory_space<vmem>>, vector<64x128xbf16>
    %cst = arith.constant dense<0.000000e+00> : vector<2x128xf32>
    %3 = tpu.matmul %1, %2, %cst {dimension_numbers = #tpu.dot_dimension_numbers<[1], [0], [0], [1], [0, 0, 1, 1], [], []>} : vector<2x64xbf16>, vector<64x128xbf16>, vector<2x128xf32> -> vector<2x128xf32>
    %c0_3 = arith.constant 0 : index
    %c0_4 = arith.constant 0 : index
    %4 = vector.load %arg2[%c0_3, %c0_4] : memref<1x128xf32, #tpu.memory_space<vmem>>, vector<1x128xf32>
    %5 = vector.broadcast %4 : vector<1x128xf32> to vector<2x128xf32>
    %6 = arith.addf %3, %5 : vector<2x128xf32>
    %c0_5 = arith.constant 0 : index
    %c0_6 = arith.constant 0 : index
    %7 = vector.load %arg3[%c0_5, %c0_6] : memref<2x128xf32, #tpu.memory_space<vmem>>, vector<2x128xf32>
    tpu.vector_store %arg3[%c0_5, %c0_6], %6 {strides = array<i32>} : memref<2x128xf32, #tpu.memory_space<vmem>>, vector<2x128xf32>,
    return
  }
}

module attributes {stable_mosaic.version = 11 : i64} {
  func.func @_rmsnorm_qkv_kernel(%arg0: i32, %arg1: memref<8x128xf32, #tpu.memory_space<vmem>>, %arg2: memref<1x128xf32, #tpu.memory_space<vmem>>, %arg3: memref<128x384xbf16, #tpu.memory_space<vmem>>, %arg4: memref<8x384xf32, #tpu.memory_space<vmem>>) attributes {dimension_semantics = [#tpu.dimension_semantics<parallel>], iteration_bounds = array<i64: 2>, scalar_prefetch = 0 : i64, scratch_operands = 0 : i64, tpu.core_type = #tpu.core_type<tc>, window_params = [{transform_indices = @transform_0, window_bounds = array<i64: 8, 128>}, {pipeline_mode = #tpu.pipeline_mode<synchronous>, transform_indices = @transform_1, window_bounds = array<i64: 1, 128>}, {pipeline_mode = #tpu.pipeline_mode<synchronous>, transform_indices = @transform_2, window_bounds = array<i64: 128, 384>}, {transform_indices = @transform_3, window_bounds = array<i64: 8, 384>}]} {
    %c0 = arith.constant 0 : index
    %c0_0 = arith.constant 0 : index
    %0 = vector.load %arg1[%c0, %c0_0] : memref<8x128xf32, #tpu.memory_space<vmem>>, vector<8x128xf32>
    %1 = arith.mulf %0, %0 : vector<8x128xf32>
    %cst = arith.constant dense<0.000000e+00> : vector<8xf32>
    %2 = vector.multi_reduction <add>, %1, %cst [1] : vector<8x128xf32> to vector<8xf32>
    %3 = vector.shape_cast %2 : vector<8xf32> to vector<8x1xf32>
    %cst_1 = arith.constant 1.280000e+02 : f32
    %4 = vector.broadcast %cst_1 : f32 to vector<8x1xf32>
    %5 = arith.divf %3, %4 : vector<8x1xf32>
    %cst_2 = arith.constant 9.99999997E-7 : f32
    %6 = vector.broadcast %cst_2 : f32 to vector<8x1xf32>
    %7 = arith.addf %5, %6 : vector<8x1xf32>
    %8 = math.rsqrt %7 : vector<8x1xf32>
    %9 = vector.broadcast %8 : vector<8x1xf32> to vector<8x128xf32>
    %10 = arith.mulf %0, %9 : vector<8x128xf32>
    %c0_3 = arith.constant 0 : index
    %c0_4 = arith.constant 0 : index
    %11 = vector.load %arg2[%c0_3, %c0_4] : memref<1x128xf32, #tpu.memory_space<vmem>>, vector<1x128xf32>
    %12 = vector.broadcast %11 : vector<1x128xf32> to vector<8x128xf32>
    %13 = arith.mulf %10, %12 : vector<8x128xf32>
    %14 = arith.truncf %13 : vector<8x128xf32> to vector<8x128xbf16>
    %c0_5 = arith.constant 0 : index
    %c0_6 = arith.constant 0 : index
    %15 = vector.load %arg3[%c0_5, %c0_6] : memref<128x384xbf16, #tpu.memory_space<vmem>>, vector<128x384xbf16>
    %cst_7 = arith.constant dense<0.000000e+00> : vector<8x384xf32>
    %16 = tpu.matmul %14, %15, %cst_7 {dimension_numbers = #tpu.dot_dimension_numbers<[1], [0], [0], [1], [0, 0, 1, 1], [], []>} : vector<8x128xbf16>, vector<128x384xbf16>, vector<8x384xf32> -> vector<8x384xf32>
    %c0_8 = arith.constant 0 : index
    %c0_9 = arith.constant 0 : index
    %17 = vector.load %arg4[%c0_8, %c0_9] : memref<8x384xf32, #tpu.memory_space<vmem>>, vector<8x384xf32>
    tpu.vector_store %arg4[%c0_8, %c0_9], %16 {strides = array<i32>} : memref<8x384xf32, #tpu.memory_space<vmem>>, vector<8x384xf32>,
    return
  }
  func.func @transform_0(%arg0: i32) -> (i32, i32) {
    %c0_i32 = arith.constant 0 : i32
    %c0_i32_0 = arith.constant 0 : i32
    return %arg0, %c0_i32 : i32, i32
  }
  func.func @transform_1(%arg0: i32) -> (i32, i32) {
    %c0_i32 = arith.constant 0 : i32
    %c0_i32_0 = arith.constant 0 : i32
    %c0_i32_1 = arith.constant 0 : i32
    return %c0_i32, %c0_i32_0 : i32, i32
  }
  func.func @transform_2(%arg0: i32) -> (i32, i32) {
    %c0_i32 = arith.constant 0 : i32
    %c0_i32_0 = arith.constant 0 : i32
    %c0_i32_1 = arith.constant 0 : i32
    return %c0_i32, %c0_i32_0 : i32, i32
  }
  func.func @transform_3(%arg0: i32) -> (i32, i32) {
    %c0_i32 = arith.constant 0 : i32
    %c0_i32_0 = arith.constant 0 : i32
    return %arg0, %c0_i32 : i32, i32
  }
}

module attributes {stable_mosaic.version = 11 : i64} {
  func.func @_rmsnorm_mlp_kernel(%arg0: i32, %arg1: memref<8x128xf32, #tpu.memory_space<vmem>>, %arg2: memref<1x128xf32, #tpu.memory_space<vmem>>, %arg3: memref<128x512xbf16, #tpu.memory_space<vmem>>, %arg4: memref<256x128xbf16, #tpu.memory_space<vmem>>, %arg5: memref<8x128xf32, #tpu.memory_space<vmem>>) attributes {dimension_semantics = [#tpu.dimension_semantics<parallel>], iteration_bounds = array<i64: 2>, scalar_prefetch = 0 : i64, scratch_operands = 0 : i64, tpu.core_type = #tpu.core_type<tc>, window_params = [{transform_indices = @transform_0, window_bounds = array<i64: 8, 128>}, {pipeline_mode = #tpu.pipeline_mode<synchronous>, transform_indices = @transform_1, window_bounds = array<i64: 1, 128>}, {pipeline_mode = #tpu.pipeline_mode<synchronous>, transform_indices = @transform_2, window_bounds = array<i64: 128, 512>}, {pipeline_mode = #tpu.pipeline_mode<synchronous>, transform_indices = @transform_3, window_bounds = array<i64: 256, 128>}, {transform_indices = @transform_4, window_bounds = array<i64: 8, 128>}]} {
    %c0 = arith.constant 0 : index
    %c0_0 = arith.constant 0 : index
    %0 = vector.load %arg1[%c0, %c0_0] : memref<8x128xf32, #tpu.memory_space<vmem>>, vector<8x128xf32>
    %1 = arith.mulf %0, %0 : vector<8x128xf32>
    %cst = arith.constant dense<0.000000e+00> : vector<8xf32>
    %2 = vector.multi_reduction <add>, %1, %cst [1] : vector<8x128xf32> to vector<8xf32>
    %3 = vector.shape_cast %2 : vector<8xf32> to vector<8x1xf32>
    %cst_1 = arith.constant 1.280000e+02 : f32
    %4 = vector.broadcast %cst_1 : f32 to vector<8x1xf32>
    %5 = arith.divf %3, %4 : vector<8x1xf32>
    %cst_2 = arith.constant 9.99999997E-7 : f32
    %6 = vector.broadcast %cst_2 : f32 to vector<8x1xf32>
    %7 = arith.addf %5, %6 : vector<8x1xf32>
    %8 = math.rsqrt %7 : vector<8x1xf32>
    %9 = vector.broadcast %8 : vector<8x1xf32> to vector<8x128xf32>
    %10 = arith.mulf %0, %9 : vector<8x128xf32>
    %c0_3 = arith.constant 0 : index
    %c0_4 = arith.constant 0 : index
    %11 = vector.load %arg2[%c0_3, %c0_4] : memref<1x128xf32, #tpu.memory_space<vmem>>, vector<1x128xf32>
    %12 = vector.broadcast %11 : vector<1x128xf32> to vector<8x128xf32>
    %13 = arith.mulf %10, %12 : vector<8x128xf32>
    %14 = arith.truncf %13 : vector<8x128xf32> to vector<8x128xbf16>
    %c0_5 = arith.constant 0 : index
    %c0_6 = arith.constant 0 : index
    %15 = vector.load %arg3[%c0_5, %c0_6] : memref<128x512xbf16, #tpu.memory_space<vmem>>, vector<128x512xbf16>
    %cst_7 = arith.constant dense<0.000000e+00> : vector<8x512xf32>
    %16 = tpu.matmul %14, %15, %cst_7 {dimension_numbers = #tpu.dot_dimension_numbers<[1], [0], [0], [1], [0, 0, 1, 1], [], []>} : vector<8x128xbf16>, vector<128x512xbf16>, vector<8x512xf32> -> vector<8x512xf32>
    %17 = vector.extract_strided_slice %16 {offsets = [0, 0], sizes = [8, 256], strides = [1, 1]} : vector<8x512xf32> to vector<8x256xf32>
    %18 = vector.extract_strided_slice %16 {offsets = [0, 256], sizes = [8, 256], strides = [1, 1]} : vector<8x512xf32> to vector<8x256xf32>
    %19 = arith.negf %17 : vector<8x256xf32>
    %20 = math.exp %19 : vector<8x256xf32>
    %cst_8 = arith.constant 1.000000e+00 : f32
    %21 = vector.broadcast %cst_8 : f32 to vector<8x256xf32>
    %22 = arith.addf %21, %20 : vector<8x256xf32>
    %23 = arith.divf %21, %22 : vector<8x256xf32>
    %24 = arith.mulf %17, %23 : vector<8x256xf32>
    %25 = arith.mulf %24, %18 : vector<8x256xf32>
    %26 = arith.truncf %25 : vector<8x256xf32> to vector<8x256xbf16>
    %c0_9 = arith.constant 0 : index
    %c0_10 = arith.constant 0 : index
    %27 = vector.load %arg4[%c0_9, %c0_10] : memref<256x128xbf16, #tpu.memory_space<vmem>>, vector<256x128xbf16>
    %cst_11 = arith.constant dense<0.000000e+00> : vector<8x128xf32>
    %28 = tpu.matmul %26, %27, %cst_11 {dimension_numbers = #tpu.dot_dimension_numbers<[1], [0], [0], [1], [0, 0, 1, 1], [], []>} : vector<8x256xbf16>, vector<256x128xbf16>, vector<8x128xf32> -> vector<8x128xf32>
    %29 = arith.addf %0, %28 : vector<8x128xf32>
    %c0_12 = arith.constant 0 : index
    %c0_13 = arith.constant 0 : index
    %30 = vector.load %arg5[%c0_12, %c0_13] : memref<8x128xf32, #tpu.memory_space<vmem>>, vector<8x128xf32>
    tpu.vector_store %arg5[%c0_12, %c0_13], %29 {strides = array<i32>} : memref<8x128xf32, #tpu.memory_space<vmem>>, vector<8x128xf32>,
    return
  }
  func.func @transform_0(%arg0: i32) -> (i32, i32) {
    %c0_i32 = arith.constant 0 : i32
    %c0_i32_0 = arith.constant 0 : i32
    return %arg0, %c0_i32 : i32, i32
  }
  func.func @transform_1(%arg0: i32) -> (i32, i32) {
    %c0_i32 = arith.constant 0 : i32
    %c0_i32_0 = arith.constant 0 : i32
    %c0_i32_1 = arith.constant 0 : i32
    return %c0_i32, %c0_i32_0 : i32, i32
  }
  func.func @transform_2(%arg0: i32) -> (i32, i32) {
    %c0_i32 = arith.constant 0 : i32
    %c0_i32_0 = arith.constant 0 : i32
    %c0_i32_1 = arith.constant 0 : i32
    return %c0_i32, %c0_i32_0 : i32, i32
  }
  func.func @transform_3(%arg0: i32) -> (i32, i32) {
    %c0_i32 = arith.constant 0 : i32
    %c0_i32_0 = arith.constant 0 : i32
    %c0_i32_1 = arith.constant 0 : i32
    return %c0_i32, %c0_i32_0 : i32, i32
  }
  func.func @transform_4(%arg0: i32) -> (i32, i32) {
    %c0_i32 = arith.constant 0 : i32
    %c0_i32_0 = arith.constant 0 : i32
    return %arg0, %c0_i32 : i32, i32
  }
}

module attributes {stable_mosaic.version = 11 : i64} {
  func.func @_attn_wo_kernel(%arg0: i32, %arg1: memref<8x384xf32, #tpu.memory_space<vmem>>, %arg2: memref<8x128xf32, #tpu.memory_space<vmem>>, %arg3: memref<1x8x8xf32, #tpu.memory_space<vmem>>, %arg4: memref<8x16xf32, #tpu.memory_space<vmem>>, %arg5: memref<8x16xf32, #tpu.memory_space<vmem>>, %arg6: memref<128x128xbf16, #tpu.memory_space<vmem>>, %arg7: memref<8x128xf32, #tpu.memory_space<vmem>>) attributes {dimension_semantics = [#tpu.dimension_semantics<parallel>], iteration_bounds = array<i64: 2>, scalar_prefetch = 0 : i64, scratch_operands = 0 : i64, tpu.core_type = #tpu.core_type<tc>, window_params = [{transform_indices = @transform_0, window_bounds = array<i64: 8, 384>}, {transform_indices = @transform_1, window_bounds = array<i64: 8, 128>}, {transform_indices = @transform_2, window_bounds = array<i64: 1, 8, 8>}, {pipeline_mode = #tpu.pipeline_mode<synchronous>, transform_indices = @transform_3, window_bounds = array<i64: 8, 16>}, {pipeline_mode = #tpu.pipeline_mode<synchronous>, transform_indices = @transform_4, window_bounds = array<i64: 8, 16>}, {pipeline_mode = #tpu.pipeline_mode<synchronous>, transform_indices = @transform_5, window_bounds = array<i64: 128, 128>}, {transform_indices = @transform_6, window_bounds = array<i64: 8, 128>}]} {
    %c0 = arith.constant 0 : index
    %c0_0 = arith.constant 0 : index
    %0 = vector.load %arg4[%c0, %c0_0] : memref<8x16xf32, #tpu.memory_space<vmem>>, vector<8x16xf32>
    %c0_1 = arith.constant 0 : index
    %c0_2 = arith.constant 0 : index
    %1 = vector.load %arg5[%c0_1, %c0_2] : memref<8x16xf32, #tpu.memory_space<vmem>>, vector<8x16xf32>
    %c0_3 = arith.constant 0 : index
    %c0_4 = arith.constant 0 : index
    %c0_5 = arith.constant 0 : index
    %2 = vector.load %arg3[%c0_3, %c0_4, %c0_5] : memref<1x8x8xf32, #tpu.memory_space<vmem>>, vector<1x8x8xf32>
    %3 = vector.shape_cast %2 : vector<1x8x8xf32> to vector<8x8xf32>
    %c0_6 = arith.constant 0 : index
    %c0_7 = arith.constant 0 : index
    %4 = vector.load %arg2[%c0_6, %c0_7] : memref<8x128xf32, #tpu.memory_space<vmem>>, vector<8x128xf32>
    %c0_8 = arith.constant 0 : index
    %c0_9 = arith.constant 0 : index
    %5 = vector.load %arg1[%c0_8, %c0_9] : memref<8x384xf32, #tpu.memory_space<vmem>>, vector<8x32xf32>
    %c0_10 = arith.constant 0 : index
    %c128 = arith.constant 128 : index
    %6 = vector.load %arg1[%c0_10, %c128] : memref<8x384xf32, #tpu.memory_space<vmem>>, vector<8x32xf32>
    %c0_11 = arith.constant 0 : index
    %c256 = arith.constant 256 : index
    %7 = vector.load %arg1[%c0_11, %c256] : memref<8x384xf32, #tpu.memory_space<vmem>>, vector<8x32xf32>
    %8 = vector.extract_strided_slice %5 {offsets = [0, 0], sizes = [8, 16], strides = [1, 1]} : vector<8x32xf32> to vector<8x16xf32>
    %9 = vector.extract_strided_slice %5 {offsets = [0, 16], sizes = [8, 16], strides = [1, 1]} : vector<8x32xf32> to vector<8x16xf32>
    %10 = vector.extract_strided_slice %6 {offsets = [0, 0], sizes = [8, 16], strides = [1, 1]} : vector<8x32xf32> to vector<8x16xf32>
    %11 = vector.extract_strided_slice %6 {offsets = [0, 16], sizes = [8, 16], strides = [1, 1]} : vector<8x32xf32> to vector<8x16xf32>
    %12 = arith.mulf %8, %0 : vector<8x16xf32>
    %13 = arith.mulf %9, %1 : vector<8x16xf32>
    %14 = arith.subf %12, %13 : vector<8x16xf32>
    %15 = arith.mulf %9, %0 : vector<8x16xf32>
    %16 = arith.mulf %8, %1 : vector<8x16xf32>
    %17 = arith.addf %15, %16 : vector<8x16xf32>
    %18 = arith.mulf %10, %0 : vector<8x16xf32>
    %19 = arith.mulf %11, %1 : vector<8x16xf32>
    %20 = arith.subf %18, %19 : vector<8x16xf32>
    %21 = arith.mulf %11, %0 : vector<8x16xf32>
    %22 = arith.mulf %10, %1 : vector<8x16xf32>
    %23 = arith.addf %21, %22 : vector<8x16xf32>
    %cst = arith.constant dense<0.000000e+00> : vector<8x8xf32>
    %24 = tpu.matmul %14, %20, %cst {dimension_numbers = #tpu.dot_dimension_numbers<[1], [1], [0], [0], [0, 0, 1, 0], [], []>} : vector<8x16xf32>, vector<8x16xf32>, vector<8x8xf32> -> vector<8x8xf32>
    %cst_12 = arith.constant dense<0.000000e+00> : vector<8x8xf32>
    %25 = tpu.matmul %17, %23, %cst_12 {dimension_numbers = #tpu.dot_dimension_numbers<[1], [1], [0], [0], [0, 0, 1, 0], [], []>} : vector<8x16xf32>, vector<8x16xf32>, vector<8x8xf32> -> vector<8x8xf32>
    %26 = arith.addf %24, %25 : vector<8x8xf32>
    %27 = arith.addf %26, %3 : vector<8x8xf32>
    %cst_13 = arith.constant dense<0xFF800000> : vector<8xf32>
    %28 = vector.multi_reduction <maximumf>, %27, %cst_13 [1] : vector<8x8xf32> to vector<8xf32>
    %29 = vector.shape_cast %28 : vector<8xf32> to vector<8x1xf32>
    %30 = vector.broadcast %29 : vector<8x1xf32> to vector<8x8xf32>
    %31 = arith.subf %27, %30 : vector<8x8xf32>
    %32 = math.exp %31 : vector<8x8xf32>
    %cst_14 = arith.constant dense<0.000000e+00> : vector<8xf32>
    %33 = vector.multi_reduction <add>, %32, %cst_14 [1] : vector<8x8xf32> to vector<8xf32>
    %34 = vector.shape_cast %33 : vector<8xf32> to vector<8x1xf32>
    %35 = tpu.reciprocal %34 {approx = true} : vector<8x1xf32> -> vector<8x1xf32>
    %36 = vector.broadcast %35 : vector<8x1xf32> to vector<8x8xf32>
    %37 = arith.mulf %32, %36 : vector<8x8xf32>
    %cst_15 = arith.constant dense<0.000000e+00> : vector<8x32xf32>
    %38 = tpu.matmul %37, %7, %cst_15 {dimension_numbers = #tpu.dot_dimension_numbers<[1], [0], [0], [1], [0, 0, 1, 1], [], []>} : vector<8x8xf32>, vector<8x32xf32>, vector<8x32xf32> -> vector<8x32xf32>
    %39 = arith.truncf %38 : vector<8x32xf32> to vector<8x32xbf16>
    %c0_16 = arith.constant 0 : index
    %c0_17 = arith.constant 0 : index
    %40 = vector.load %arg6[%c0_16, %c0_17] : memref<128x128xbf16, #tpu.memory_space<vmem>>, vector<32x128xbf16>
    %cst_18 = arith.constant dense<0.000000e+00> : vector<8x128xf32>
    %41 = tpu.matmul %39, %40, %cst_18 {dimension_numbers = #tpu.dot_dimension_numbers<[1], [0], [0], [1], [0, 0, 1, 1], [], []>} : vector<8x32xbf16>, vector<32x128xbf16>, vector<8x128xf32> -> vector<8x128xf32>
    %42 = arith.addf %4, %41 : vector<8x128xf32>
    %c0_19 = arith.constant 0 : index
    %c32 = arith.constant 32 : index
    %43 = vector.load %arg1[%c0_19, %c32] : memref<8x384xf32, #tpu.memory_space<vmem>>, vector<8x32xf32>
    %c0_20 = arith.constant 0 : index
    %c160 = arith.constant 160 : index
    %44 = vector.load %arg1[%c0_20, %c160] : memref<8x384xf32, #tpu.memory_space<vmem>>, vector<8x32xf32>
    %c0_21 = arith.constant 0 : index
    %c288 = arith.constant 288 : index
    %45 = vector.load %arg1[%c0_21, %c288] : memref<8x384xf32, #tpu.memory_space<vmem>>, vector<8x32xf32>
    %46 = vector.extract_strided_slice %43 {offsets = [0, 0], sizes = [8, 16], strides = [1, 1]} : vector<8x32xf32> to vector<8x16xf32>
    %47 = vector.extract_strided_slice %43 {offsets = [0, 16], sizes = [8, 16], strides = [1, 1]} : vector<8x32xf32> to vector<8x16xf32>
    %48 = vector.extract_strided_slice %44 {offsets = [0, 0], sizes = [8, 16], strides = [1, 1]} : vector<8x32xf32> to vector<8x16xf32>
    %49 = vector.extract_strided_slice %44 {offsets = [0, 16], sizes = [8, 16], strides = [1, 1]} : vector<8x32xf32> to vector<8x16xf32>
    %50 = arith.mulf %46, %0 : vector<8x16xf32>
    %51 = arith.mulf %47, %1 : vector<8x16xf32>
    %52 = arith.subf %50, %51 : vector<8x16xf32>
    %53 = arith.mulf %47, %0 : vector<8x16xf32>
    %54 = arith.mulf %46, %1 : vector<8x16xf32>
    %55 = arith.addf %53, %54 : vector<8x16xf32>
    %56 = arith.mulf %48, %0 : vector<8x16xf32>
    %57 = arith.mulf %49, %1 : vector<8x16xf32>
    %58 = arith.subf %56, %57 : vector<8x16xf32>
    %59 = arith.mulf %49, %0 : vector<8x16xf32>
    %60 = arith.mulf %48, %1 : vector<8x16xf32>
    %61 = arith.addf %59, %60 : vector<8x16xf32>
    %cst_22 = arith.constant dense<0.000000e+00> : vector<8x8xf32>
    %62 = tpu.matmul %52, %58, %cst_22 {dimension_numbers = #tpu.dot_dimension_numbers<[1], [1], [0], [0], [0, 0, 1, 0], [], []>} : vector<8x16xf32>, vector<8x16xf32>, vector<8x8xf32> -> vector<8x8xf32>
    %cst_23 = arith.constant dense<0.000000e+00> : vector<8x8xf32>
    %63 = tpu.matmul %55, %61, %cst_23 {dimension_numbers = #tpu.dot_dimension_numbers<[1], [1], [0], [0], [0, 0, 1, 0], [], []>} : vector<8x16xf32>, vector<8x16xf32>, vector<8x8xf32> -> vector<8x8xf32>
    %64 = arith.addf %62, %63 : vector<8x8xf32>
    %65 = arith.addf %64, %3 : vector<8x8xf32>
    %cst_24 = arith.constant dense<0xFF800000> : vector<8xf32>
    %66 = vector.multi_reduction <maximumf>, %65, %cst_24 [1] : vector<8x8xf32> to vector<8xf32>
    %67 = vector.shape_cast %66 : vector<8xf32> to vector<8x1xf32>
    %68 = vector.broadcast %67 : vector<8x1xf32> to vector<8x8xf32>
    %69 = arith.subf %65, %68 : vector<8x8xf32>
    %70 = math.exp %69 : vector<8x8xf32>
    %cst_25 = arith.constant dense<0.000000e+00> : vector<8xf32>
    %71 = vector.multi_reduction <add>, %70, %cst_25 [1] : vector<8x8xf32> to vector<8xf32>
    %72 = vector.shape_cast %71 : vector<8xf32> to vector<8x1xf32>
    %73 = tpu.reciprocal %72 {approx = true} : vector<8x1xf32> -> vector<8x1xf32>
    %74 = vector.broadcast %73 : vector<8x1xf32> to vector<8x8xf32>
    %75 = arith.mulf %70, %74 : vector<8x8xf32>
    %cst_26 = arith.constant dense<0.000000e+00> : vector<8x32xf32>
    %76 = tpu.matmul %75, %45, %cst_26 {dimension_numbers = #tpu.dot_dimension_numbers<[1], [0], [0], [1], [0, 0, 1, 1], [], []>} : vector<8x8xf32>, vector<8x32xf32>, vector<8x32xf32> -> vector<8x32xf32>
    %77 = arith.truncf %76 : vector<8x32xf32> to vector<8x32xbf16>
    %c32_27 = arith.constant 32 : index
    %c0_28 = arith.constant 0 : index
    %78 = vector.load %arg6[%c32_27, %c0_28] : memref<128x128xbf16, #tpu.memory_space<vmem>>, vector<32x128xbf16>
    %cst_29 = arith.constant dense<0.000000e+00> : vector<8x128xf32>
    %79 = tpu.matmul %77, %78, %cst_29 {dimension_numbers = #tpu.dot_dimension_numbers<[1], [0], [0], [1], [0, 0, 1, 1], [], []>} : vector<8x32xbf16>, vector<32x128xbf16>, vector<8x128xf32> -> vector<8x128xf32>
    %80 = arith.addf %42, %79 : vector<8x128xf32>
    %c0_30 = arith.constant 0 : index
    %c64 = arith.constant 64 : index
    %81 = vector.load %arg1[%c0_30, %c64] : memref<8x384xf32, #tpu.memory_space<vmem>>, vector<8x32xf32>
    %c0_31 = arith.constant 0 : index
    %c192 = arith.constant 192 : index
    %82 = vector.load %arg1[%c0_31, %c192] : memref<8x384xf32, #tpu.memory_space<vmem>>, vector<8x32xf32>
    %c0_32 = arith.constant 0 : index
    %c320 = arith.constant 320 : index
    %83 = vector.load %arg1[%c0_32, %c320] : memref<8x384xf32, #tpu.memory_space<vmem>>, vector<8x32xf32>
    %84 = vector.extract_strided_slice %81 {offsets = [0, 0], sizes = [8, 16], strides = [1, 1]} : vector<8x32xf32> to vector<8x16xf32>
    %85 = vector.extract_strided_slice %81 {offsets = [0, 16], sizes = [8, 16], strides = [1, 1]} : vector<8x32xf32> to vector<8x16xf32>
    %86 = vector.extract_strided_slice %82 {offsets = [0, 0], sizes = [8, 16], strides = [1, 1]} : vector<8x32xf32> to vector<8x16xf32>
    %87 = vector.extract_strided_slice %82 {offsets = [0, 16], sizes = [8, 16], strides = [1, 1]} : vector<8x32xf32> to vector<8x16xf32>
    %88 = arith.mulf %84, %0 : vector<8x16xf32>
    %89 = arith.mulf %85, %1 : vector<8x16xf32>
    %90 = arith.subf %88, %89 : vector<8x16xf32>
    %91 = arith.mulf %85, %0 : vector<8x16xf32>
    %92 = arith.mulf %84, %1 : vector<8x16xf32>
    %93 = arith.addf %91, %92 : vector<8x16xf32>
    %94 = arith.mulf %86, %0 : vector<8x16xf32>
    %95 = arith.mulf %87, %1 : vector<8x16xf32>
    %96 = arith.subf %94, %95 : vector<8x16xf32>
    %97 = arith.mulf %87, %0 : vector<8x16xf32>
    %98 = arith.mulf %86, %1 : vector<8x16xf32>
    %99 = arith.addf %97, %98 : vector<8x16xf32>
    %cst_33 = arith.constant dense<0.000000e+00> : vector<8x8xf32>
    %100 = tpu.matmul %90, %96, %cst_33 {dimension_numbers = #tpu.dot_dimension_numbers<[1], [1], [0], [0], [0, 0, 1, 0], [], []>} : vector<8x16xf32>, vector<8x16xf32>, vector<8x8xf32> -> vector<8x8xf32>
    %cst_34 = arith.constant dense<0.000000e+00> : vector<8x8xf32>
    %101 = tpu.matmul %93, %99, %cst_34 {dimension_numbers = #tpu.dot_dimension_numbers<[1], [1], [0], [0], [0, 0, 1, 0], [], []>} : vector<8x16xf32>, vector<8x16xf32>, vector<8x8xf32> -> vector<8x8xf32>
    %102 = arith.addf %100, %101 : vector<8x8xf32>
    %103 = arith.addf %102, %3 : vector<8x8xf32>
    %cst_35 = arith.constant dense<0xFF800000> : vector<8xf32>
    %104 = vector.multi_reduction <maximumf>, %103, %cst_35 [1] : vector<8x8xf32> to vector<8xf32>
    %105 = vector.shape_cast %104 : vector<8xf32> to vector<8x1xf32>
    %106 = vector.broadcast %105 : vector<8x1xf32> to vector<8x8xf32>
    %107 = arith.subf %103, %106 : vector<8x8xf32>
    %108 = math.exp %107 : vector<8x8xf32>
    %cst_36 = arith.constant dense<0.000000e+00> : vector<8xf32>
    %109 = vector.multi_reduction <add>, %108, %cst_36 [1] : vector<8x8xf32> to vector<8xf32>
    %110 = vector.shape_cast %109 : vector<8xf32> to vector<8x1xf32>
    %111 = tpu.reciprocal %110 {approx = true} : vector<8x1xf32> -> vector<8x1xf32>
    %112 = vector.broadcast %111 : vector<8x1xf32> to vector<8x8xf32>
    %113 = arith.mulf %108, %112 : vector<8x8xf32>
    %cst_37 = arith.constant dense<0.000000e+00> : vector<8x32xf32>
    %114 = tpu.matmul %113, %83, %cst_37 {dimension_numbers = #tpu.dot_dimension_numbers<[1], [0], [0], [1], [0, 0, 1, 1], [], []>} : vector<8x8xf32>, vector<8x32xf32>, vector<8x32xf32> -> vector<8x32xf32>
    %115 = arith.truncf %114 : vector<8x32xf32> to vector<8x32xbf16>
    %c64_38 = arith.constant 64 : index
    %c0_39 = arith.constant 0 : index
    %116 = vector.load %arg6[%c64_38, %c0_39] : memref<128x128xbf16, #tpu.memory_space<vmem>>, vector<32x128xbf16>
    %cst_40 = arith.constant dense<0.000000e+00> : vector<8x128xf32>
    %117 = tpu.matmul %115, %116, %cst_40 {dimension_numbers = #tpu.dot_dimension_numbers<[1], [0], [0], [1], [0, 0, 1, 1], [], []>} : vector<8x32xbf16>, vector<32x128xbf16>, vector<8x128xf32> -> vector<8x128xf32>
    %118 = arith.addf %80, %117 : vector<8x128xf32>
    %c0_41 = arith.constant 0 : index
    %c96 = arith.constant 96 : index
    %119 = vector.load %arg1[%c0_41, %c96] : memref<8x384xf32, #tpu.memory_space<vmem>>, vector<8x32xf32>
    %c0_42 = arith.constant 0 : index
    %c224 = arith.constant 224 : index
    %120 = vector.load %arg1[%c0_42, %c224] : memref<8x384xf32, #tpu.memory_space<vmem>>, vector<8x32xf32>
    %c0_43 = arith.constant 0 : index
    %c352 = arith.constant 352 : index
    %121 = vector.load %arg1[%c0_43, %c352] : memref<8x384xf32, #tpu.memory_space<vmem>>, vector<8x32xf32>
    %122 = vector.extract_strided_slice %119 {offsets = [0, 0], sizes = [8, 16], strides = [1, 1]} : vector<8x32xf32> to vector<8x16xf32>
    %123 = vector.extract_strided_slice %119 {offsets = [0, 16], sizes = [8, 16], strides = [1, 1]} : vector<8x32xf32> to vector<8x16xf32>
    %124 = vector.extract_strided_slice %120 {offsets = [0, 0], sizes = [8, 16], strides = [1, 1]} : vector<8x32xf32> to vector<8x16xf32>
    %125 = vector.extract_strided_slice %120 {offsets = [0, 16], sizes = [8, 16], strides = [1, 1]} : vector<8x32xf32> to vector<8x16xf32>
    %126 = arith.mulf %122, %0 : vector<8x16xf32>
    %127 = arith.mulf %123, %1 : vector<8x16xf32>
    %128 = arith.subf %126, %127 : vector<8x16xf32>
    %129 = arith.mulf %123, %0 : vector<8x16xf32>
    %130 = arith.mulf %122, %1 : vector<8x16xf32>
    %131 = arith.addf %129, %130 : vector<8x16xf32>
    %132 = arith.mulf %124, %0 : vector<8x16xf32>
    %133 = arith.mulf %125, %1 : vector<8x16xf32>
    %134 = arith.subf %132, %133 : vector<8x16xf32>
    %135 = arith.mulf %125, %0 : vector<8x16xf32>
    %136 = arith.mulf %124, %1 : vector<8x16xf32>
    %137 = arith.addf %135, %136 : vector<8x16xf32>
    %cst_44 = arith.constant dense<0.000000e+00> : vector<8x8xf32>
    %138 = tpu.matmul %128, %134, %cst_44 {dimension_numbers = #tpu.dot_dimension_numbers<[1], [1], [0], [0], [0, 0, 1, 0], [], []>} : vector<8x16xf32>, vector<8x16xf32>, vector<8x8xf32> -> vector<8x8xf32>
    %cst_45 = arith.constant dense<0.000000e+00> : vector<8x8xf32>
    %139 = tpu.matmul %131, %137, %cst_45 {dimension_numbers = #tpu.dot_dimension_numbers<[1], [1], [0], [0], [0, 0, 1, 0], [], []>} : vector<8x16xf32>, vector<8x16xf32>, vector<8x8xf32> -> vector<8x8xf32>
    %140 = arith.addf %138, %139 : vector<8x8xf32>
    %141 = arith.addf %140, %3 : vector<8x8xf32>
    %cst_46 = arith.constant dense<0xFF800000> : vector<8xf32>
    %142 = vector.multi_reduction <maximumf>, %141, %cst_46 [1] : vector<8x8xf32> to vector<8xf32>
    %143 = vector.shape_cast %142 : vector<8xf32> to vector<8x1xf32>
    %144 = vector.broadcast %143 : vector<8x1xf32> to vector<8x8xf32>
    %145 = arith.subf %141, %144 : vector<8x8xf32>
    %146 = math.exp %145 : vector<8x8xf32>
    %cst_47 = arith.constant dense<0.000000e+00> : vector<8xf32>
    %147 = vector.multi_reduction <add>, %146, %cst_47 [1] : vector<8x8xf32> to vector<8xf32>
    %148 = vector.shape_cast %147 : vector<8xf32> to vector<8x1xf32>
    %149 = tpu.reciprocal %148 {approx = true} : vector<8x1xf32> -> vector<8x1xf32>
    %150 = vector.broadcast %149 : vector<8x1xf32> to vector<8x8xf32>
    %151 = arith.mulf %146, %150 : vector<8x8xf32>
    %cst_48 = arith.constant dense<0.000000e+00> : vector<8x32xf32>
    %152 = tpu.matmul %151, %121, %cst_48 {dimension_numbers = #tpu.dot_dimension_numbers<[1], [0], [0], [1], [0, 0, 1, 1], [], []>} : vector<8x8xf32>, vector<8x32xf32>, vector<8x32xf32> -> vector<8x32xf32>
    %153 = arith.truncf %152 : vector<8x32xf32> to vector<8x32xbf16>
    %c96_49 = arith.constant 96 : index
    %c0_50 = arith.constant 0 : index
    %154 = vector.load %arg6[%c96_49, %c0_50] : memref<128x128xbf16, #tpu.memory_space<vmem>>, vector<32x128xbf16>
    %cst_51 = arith.constant dense<0.000000e+00> : vector<8x128xf32>
    %155 = tpu.matmul %153, %154, %cst_51 {dimension_numbers = #tpu.dot_dimension_numbers<[1], [0], [0], [1], [0, 0, 1, 1], [], []>} : vector<8x32xbf16>, vector<32x128xbf16>, vector<8x128xf32> -> vector<8x128xf32>
    %156 = arith.addf %118, %155 : vector<8x128xf32>
    %c0_52 = arith.constant 0 : index
    %c0_53 = arith.constant 0 : index
    %157 = vector.load %arg7[%c0_52, %c0_53] : memref<8x128xf32, #tpu.memory_space<vmem>>, vector<8x128xf32>
    tpu.vector_store %arg7[%c0_52, %c0_53], %156 {strides = array<i32>} : memref<8x128xf32, #tpu.memory_space<vmem>>, vector<8x128xf32>,
    return
  }
  func.func @transform_0(%arg0: i32) -> (i32, i32) {
    %c0_i32 = arith.constant 0 : i32
    %c0_i32_0 = arith.constant 0 : i32
    return %arg0, %c0_i32 : i32, i32
  }
  func.func @transform_1(%arg0: i32) -> (i32, i32) {
    %c0_i32 = arith.constant 0 : i32
    %c0_i32_0 = arith.constant 0 : i32
    return %arg0, %c0_i32 : i32, i32
  }
  func.func @transform_2(%arg0: i32) -> (i32, i32, i32) {
    %c0_i32 = arith.constant 0 : i32
    %c0_i32_0 = arith.constant 0 : i32
    %c0_i32_1 = arith.constant 0 : i32
    return %arg0, %c0_i32, %c0_i32_0 : i32, i32, i32
  }
  func.func @transform_3(%arg0: i32) -> (i32, i32) {
    %c0_i32 = arith.constant 0 : i32
    %c0_i32_0 = arith.constant 0 : i32
    %c0_i32_1 = arith.constant 0 : i32
    return %c0_i32, %c0_i32_0 : i32, i32
  }
  func.func @transform_4(%arg0: i32) -> (i32, i32) {
    %c0_i32 = arith.constant 0 : i32
    %c0_i32_0 = arith.constant 0 : i32
    %c0_i32_1 = arith.constant 0 : i32
    return %c0_i32, %c0_i32_0 : i32, i32
  }
  func.func @transform_5(%arg0: i32) -> (i32, i32) {
    %c0_i32 = arith.constant 0 : i32
    %c0_i32_0 = arith.constant 0 : i32
    %c0_i32_1 = arith.constant 0 : i32
    return %c0_i32, %c0_i32_0 : i32, i32
  }
  func.func @transform_6(%arg0: i32) -> (i32, i32) {
    %c0_i32 = arith.constant 0 : i32
    %c0_i32_0 = arith.constant 0 : i32
    return %arg0, %c0_i32 : i32, i32
  }
}

module attributes {stable_mosaic.version = 11 : i64} {
  func.func @_lmhead_ce_kernel(%arg0: i32, %arg1: memref<14x128xf32, #tpu.memory_space<vmem>>, %arg2: memref<1x128xf32, #tpu.memory_space<vmem>>, %arg3: memref<128x128xbf16, #tpu.memory_space<vmem>>, %arg4: memref<14x1xi32, #tpu.memory_space<vmem>>, %arg5: memref<1x1xf32, #tpu.memory_space<vmem>>, %arg6: memref<14x128xf32, #tpu.memory_space<vmem>>, %arg7: memref<14x1xf32, #tpu.memory_space<vmem>>, %arg8: memref<14x1xf32, #tpu.memory_space<vmem>>, %arg9: memref<14x1xf32, #tpu.memory_space<vmem>>) attributes {dimension_semantics = [#tpu.dimension_semantics<arbitrary>], iteration_bounds = array<i64: 4>, scalar_prefetch = 0 : i64, scratch_operands = 4 : i64, tpu.core_type = #tpu.core_type<tc>, window_params = [{pipeline_mode = #tpu.pipeline_mode<synchronous>, transform_indices = @transform_0, window_bounds = array<i64: 14, 128>}, {pipeline_mode = #tpu.pipeline_mode<synchronous>, transform_indices = @transform_1, window_bounds = array<i64: 1, 128>}, {transform_indices = @transform_2, window_bounds = array<i64: 128, 128>}, {pipeline_mode = #tpu.pipeline_mode<synchronous>, transform_indices = @transform_3, window_bounds = array<i64: 14, 1>}, {pipeline_mode = #tpu.pipeline_mode<synchronous>, transform_indices = @transform_4, window_bounds = array<i64: 1, 1>}]} {
    %c0_i32 = arith.constant 0 : i32
    %0 = arith.cmpi eq, %arg0, %c0_i32 : i32
    %1 = arith.extui %0 : i1 to i32
    %c0_i32_0 = arith.constant 0 : i32
    %2 = arith.cmpi ne, %1, %c0_i32_0 : i32
    scf.if %2 {
      %c0_25 = arith.constant 0 : index
      %c0_26 = arith.constant 0 : index
      %41 = vector.load %arg1[%c0_25, %c0_26] : memref<14x128xf32, #tpu.memory_space<vmem>>, vector<14x128xf32>
      %42 = arith.mulf %41, %41 : vector<14x128xf32>
      %cst_27 = arith.constant dense<0.000000e+00> : vector<14xf32>
      %43 = vector.multi_reduction <add>, %42, %cst_27 [1] : vector<14x128xf32> to vector<14xf32>
      %44 = vector.shape_cast %43 : vector<14xf32> to vector<14x1xf32>
      %cst_28 = arith.constant 1.280000e+02 : f32
      %45 = vector.broadcast %cst_28 : f32 to vector<14x1xf32>
      %46 = arith.divf %44, %45 : vector<14x1xf32>
      %cst_29 = arith.constant 9.99999997E-7 : f32
      %47 = vector.broadcast %cst_29 : f32 to vector<14x1xf32>
      %48 = arith.addf %46, %47 : vector<14x1xf32>
      %49 = math.rsqrt %48 : vector<14x1xf32>
      %50 = vector.broadcast %49 : vector<14x1xf32> to vector<14x128xf32>
      %51 = arith.mulf %41, %50 : vector<14x128xf32>
      %c0_30 = arith.constant 0 : index
      %c0_31 = arith.constant 0 : index
      %52 = vector.load %arg2[%c0_30, %c0_31] : memref<1x128xf32, #tpu.memory_space<vmem>>, vector<1x128xf32>
      %53 = vector.broadcast %52 : vector<1x128xf32> to vector<14x128xf32>
      %54 = arith.mulf %51, %53 : vector<14x128xf32>
      %c0_32 = arith.constant 0 : index
      %c0_33 = arith.constant 0 : index
      %55 = vector.load %arg6[%c0_32, %c0_33] : memref<14x128xf32, #tpu.memory_space<vmem>>, vector<14x128xf32>
      tpu.vector_store %arg6[%c0_32, %c0_33], %54 {strides = array<i32>} : memref<14x128xf32, #tpu.memory_space<vmem>>, vector<14x128xf32>,
      %cst_34 = arith.constant 0xFF800000 : f32
      %56 = vector.broadcast %cst_34 : f32 to vector<14x1xf32>
      %c0_35 = arith.constant 0 : index
      %c0_36 = arith.constant 0 : index
      %57 = vector.load %arg7[%c0_35, %c0_36] : memref<14x1xf32, #tpu.memory_space<vmem>>, vector<14x1xf32>
      tpu.vector_store %arg7[%c0_35, %c0_36], %56 {strides = array<i32>} : memref<14x1xf32, #tpu.memory_space<vmem>>, vector<14x1xf32>,
      %cst_37 = arith.constant 0.000000e+00 : f32
      %58 = vector.broadcast %cst_37 : f32 to vector<14x1xf32>
      %c0_38 = arith.constant 0 : index
      %c0_39 = arith.constant 0 : index
      %59 = vector.load %arg8[%c0_38, %c0_39] : memref<14x1xf32, #tpu.memory_space<vmem>>, vector<14x1xf32>
      tpu.vector_store %arg8[%c0_38, %c0_39], %58 {strides = array<i32>} : memref<14x1xf32, #tpu.memory_space<vmem>>, vector<14x1xf32>,
      %cst_40 = arith.constant 0.000000e+00 : f32
      %60 = vector.broadcast %cst_40 : f32 to vector<14x1xf32>
      %c0_41 = arith.constant 0 : index
      %c0_42 = arith.constant 0 : index
      %61 = vector.load %arg9[%c0_41, %c0_42] : memref<14x1xf32, #tpu.memory_space<vmem>>, vector<14x1xf32>
      tpu.vector_store %arg9[%c0_41, %c0_42], %60 {strides = array<i32>} : memref<14x1xf32, #tpu.memory_space<vmem>>, vector<14x1xf32>,
    } else {
    }
    %c0 = arith.constant 0 : index
    %c0_1 = arith.constant 0 : index
    %3 = vector.load %arg6[%c0, %c0_1] : memref<14x128xf32, #tpu.memory_space<vmem>>, vector<14x128xf32>
    %4 = arith.truncf %3 : vector<14x128xf32> to vector<14x128xbf16>
    %c0_2 = arith.constant 0 : index
    %c0_3 = arith.constant 0 : index
    %5 = vector.load %arg3[%c0_2, %c0_3] : memref<128x128xbf16, #tpu.memory_space<vmem>>, vector<128x128xbf16>
    %cst = arith.constant dense<0.000000e+00> : vector<14x128xf32>
    %6 = tpu.matmul %4, %5, %cst {dimension_numbers = #tpu.dot_dimension_numbers<[1], [0], [0], [1], [0, 0, 1, 1], [], []>} : vector<14x128xbf16>, vector<128x128xbf16>, vector<14x128xf32> -> vector<14x128xf32>
    %7 = tpu.iota {dimensions = array<i32: 1>} : vector<14x128xi32>
    %c128_i32 = arith.constant 128 : i32
    %8 = arith.muli %arg0, %c128_i32 : i32
    %9 = vector.broadcast %8 : i32 to vector<14x128xi32>
    %10 = arith.addi %7, %9 : vector<14x128xi32>
    %c0_4 = arith.constant 0 : index
    %c0_5 = arith.constant 0 : index
    %11 = vector.load %arg4[%c0_4, %c0_5] : memref<14x1xi32, #tpu.memory_space<vmem>>, vector<14x1xi32>
    %12 = vector.broadcast %11 : vector<14x1xi32> to vector<14x128xi32>
    %13 = arith.cmpi eq, %10, %12 : vector<14x128xi32>
    %c0_6 = arith.constant 0 : index
    %c0_7 = arith.constant 0 : index
    %14 = vector.load %arg9[%c0_6, %c0_7] : memref<14x1xf32, #tpu.memory_space<vmem>>, vector<14x1xf32>
    %cst_8 = arith.constant 0.000000e+00 : f32
    %15 = vector.broadcast %cst_8 : f32 to vector<14x128xf32>
    %16 = arith.select %13, %6, %15 : vector<14x128xi1>, vector<14x128xf32>
    %cst_9 = arith.constant dense<0.000000e+00> : vector<14xf32>
    %17 = vector.multi_reduction <add>, %16, %cst_9 [1] : vector<14x128xf32> to vector<14xf32>
    %18 = vector.shape_cast %17 : vector<14xf32> to vector<14x1xf32>
    %19 = arith.addf %14, %18 : vector<14x1xf32>
    %c0_10 = arith.constant 0 : index
    %c0_11 = arith.constant 0 : index
    %20 = vector.load %arg9[%c0_10, %c0_11] : memref<14x1xf32, #tpu.memory_space<vmem>>, vector<14x1xf32>
    tpu.vector_store %arg9[%c0_10, %c0_11], %19 {strides = array<i32>} : memref<14x1xf32, #tpu.memory_space<vmem>>, vector<14x1xf32>,
    %c0_12 = arith.constant 0 : index
    %c0_13 = arith.constant 0 : index
    %21 = vector.load %arg7[%c0_12, %c0_13] : memref<14x1xf32, #tpu.memory_space<vmem>>, vector<14x1xf32>
    %cst_14 = arith.constant dense<0xFF800000> : vector<14xf32>
    %22 = vector.multi_reduction <maximumf>, %6, %cst_14 [1] : vector<14x128xf32> to vector<14xf32>
    %23 = vector.shape_cast %22 : vector<14xf32> to vector<14x1xf32>
    %24 = arith.maximumf %21, %23 : vector<14x1xf32>
    %c0_15 = arith.constant 0 : index
    %c0_16 = arith.constant 0 : index
    %25 = vector.load %arg8[%c0_15, %c0_16] : memref<14x1xf32, #tpu.memory_space<vmem>>, vector<14x1xf32>
    %c0_17 = arith.constant 0 : index
    %c0_18 = arith.constant 0 : index
    %26 = vector.load %arg7[%c0_17, %c0_18] : memref<14x1xf32, #tpu.memory_space<vmem>>, vector<14x1xf32>
    %27 = arith.subf %26, %24 : vector<14x1xf32>
    %28 = math.exp %27 : vector<14x1xf32>
    %29 = arith.mulf %25, %28 : vector<14x1xf32>
    %30 = vector.broadcast %24 : vector<14x1xf32> to vector<14x128xf32>
    %31 = arith.subf %6, %30 : vector<14x128xf32>
    %32 = math.exp %31 : vector<14x128xf32>
    %cst_19 = arith.constant dense<0.000000e+00> : vector<14xf32>
    %33 = vector.multi_reduction <add>, %32, %cst_19 [1] : vector<14x128xf32> to vector<14xf32>
    %34 = vector.shape_cast %33 : vector<14xf32> to vector<14x1xf32>
    %35 = arith.addf %29, %34 : vector<14x1xf32>
    %c0_20 = arith.constant 0 : index
    %c0_21 = arith.constant 0 : index
    %36 = vector.load %arg8[%c0_20, %c0_21] : memref<14x1xf32, #tpu.memory_space<vmem>>, vector<14x1xf32>
    tpu.vector_store %arg8[%c0_20, %c0_21], %35 {strides = array<i32>} : memref<14x1xf32, #tpu.memory_space<vmem>>, vector<14x1xf32>,
    %c0_22 = arith.constant 0 : index
    %c0_23 = arith.constant 0 : index
    %37 = vector.load %arg7[%c0_22, %c0_23] : memref<14x1xf32, #tpu.memory_space<vmem>>, vector<14x1xf32>
    tpu.vector_store %arg7[%c0_22, %c0_23], %24 {strides = array<i32>} : memref<14x1xf32, #tpu.memory_space<vmem>>, vector<14x1xf32>,
    %c3_i32 = arith.constant 3 : i32
    %38 = arith.cmpi eq, %arg0, %c3_i32 : i32
    %39 = arith.extui %38 : i1 to i32
    %c0_i32_24 = arith.constant 0 : i32
    %40 = arith.cmpi ne, %39, %c0_i32_24 : i32
    scf.if %40 {
      %c0_25 = arith.constant 0 : index
      %c0_26 = arith.constant 0 : index
      %41 = vector.load %arg7[%c0_25, %c0_26] : memref<14x1xf32, #tpu.memory_space<vmem>>, vector<14x1xf32>
      %c0_27 = arith.constant 0 : index
      %c0_28 = arith.constant 0 : index
      %42 = vector.load %arg8[%c0_27, %c0_28] : memref<14x1xf32, #tpu.memory_space<vmem>>, vector<14x1xf32>
      %43 = math.log %42 : vector<14x1xf32>
      %44 = arith.addf %41, %43 : vector<14x1xf32>
      %c0_29 = arith.constant 0 : index
      %c0_30 = arith.constant 0 : index
      %45 = vector.load %arg9[%c0_29, %c0_30] : memref<14x1xf32, #tpu.memory_space<vmem>>, vector<14x1xf32>
      %46 = arith.subf %44, %45 : vector<14x1xf32>
      %47 = vector.shape_cast %46 : vector<14x1xf32> to vector<1x14x1xf32>
      %cst_31 = arith.constant dense<0.000000e+00> : vector<1xf32>
      %48 = vector.multi_reduction <add>, %47, %cst_31 [1, 2] : vector<1x14x1xf32> to vector<1xf32>
      %49 = vector.shape_cast %48 : vector<1xf32> to vector<1x1x1xf32>
      %50 = vector.extract %49[0, 0, 0] : f32 from vector<1x1x1xf32>
      %51 = vector.broadcast %50 : f32 to vector<1x1xf32>
      %cst_32 = arith.constant 1.400000e+01 : f32
      %52 = vector.broadcast %cst_32 : f32 to vector<1x1xf32>
      %53 = arith.divf %51, %52 : vector<1x1xf32>
      %c0_33 = arith.constant 0 : index
      %c0_34 = arith.constant 0 : index
      %54 = vector.load %arg5[%c0_33, %c0_34] : memref<1x1xf32, #tpu.memory_space<vmem>>, vector<1x1xf32>
      tpu.vector_store %arg5[%c0_33, %c0_34], %53 {strides = array<i32>} : memref<1x1xf32, #tpu.memory_space<vmem>>, vector<1x1xf32>,
    } else {
    }
    return
  }
  func.func @transform_0(%arg0: i32) -> (i32, i32) {
    %c0_i32 = arith.constant 0 : i32
    %c0_i32_0 = arith.constant 0 : i32
    %c0_i32_1 = arith.constant 0 : i32
    return %c0_i32, %c0_i32_0 : i32, i32
  }
  func.func @transform_1(%arg0: i32) -> (i32, i32) {
    %c0_i32 = arith.constant 0 : i32
    %c0_i32_0 = arith.constant 0 : i32
    %c0_i32_1 = arith.constant 0 : i32
    return %c0_i32, %c0_i32_0 : i32, i32
  }
  func.func @transform_2(%arg0: i32) -> (i32, i32) {
    %c0_i32 = arith.constant 0 : i32
    %c0_i32_0 = arith.constant 0 : i32
    return %c0_i32, %arg0 : i32, i32
  }
  func.func @transform_3(%arg0: i32) -> (i32, i32) {
    %c0_i32 = arith.constant 0 : i32
    %c0_i32_0 = arith.constant 0 : i32
    %c0_i32_1 = arith.constant 0 : i32
    return %c0_i32, %c0_i32_0 : i32, i32
  }
  func.func @transform_4(%arg0: i32) -> (i32, i32) {
    %c0_i32 = arith.constant 0 : i32
    %c0_i32_0 = arith.constant 0 : i32
    %c0_i32_1 = arith.constant 0 : i32
    return %c0_i32, %c0_i32_0 : i32, i32
  }
}

</mosaic_0001>

<bundles_post_ra>
// kernel: _lambda_.8
= control target key start
LH: loop header
LB: loop body
LE: loop exit
PB: predicated region body
PF: predicated region fallthrough
CT: control target
= control target key end

     0   :  { %v134_v0 = vmov 0.0   ;;  %vm135_vm0 = vmmov 0   ;;  %vm56_vm1 = vcmask 523264   ;;  %s177_s1 = inlined_call_operand.vmem [shape: bf16[64,128], index: 1, kind: input, shape index: {}]   ;;  %s178_s0 = inlined_call_operand.vmem [shape: f32[2,64], index: 0, kind: input, shape index: {}]   ;;  %s179_s2 = inlined_call_operand.vmem [shape: f32[1,128], index: 2, kind: input, shape index: {}]   ;;  %s180_s3 = inlined_call_operand.vmem [shape: f32[2,128], index: 3, kind: output, shape index: {}]  }
   0x1   :  { %116 = vmatprep.subr.bf16.mxu0 %v134_v0  ;;  %v130_v1 = vld [vmem:[%s177_s1 + $0x18] sm:$0xff]   ;;  %124 = vmatprep.mubr.msk.bf16.mxu0 %vm135_vm0, %v134_v0  ;;  %v131_v2 = vld [vmem:[%s177_s1 + $0x10] sm:$0xff]   ;;  %v132_v3 = vld [vmem:[%s177_s1 + $0x8] sm:$0xff]  }
   0x2   :  { %117 = vmatpush3.bf16.msra.mxu0 %v130_v1  ;;  %v133_v4 = vld [vmem:[%s177_s1] sm:$0xff]  }
   0x3   :  { %118 = vmatprep.subr.bf16.mxu0 %v134_v0  ;;  %v15_v5 = vld [vmem:[%s178_s0] sm:$0x3] }
   0x4   :  { %v16_v6 = vpack.c.bf16 %v15_v5, %v15_v5  ;;  %v105_v7 = vld [vmem:[%s179_s2] ss:$0 sm:$0xff] }
   0x6   :  { %119 = vmatpush3.bf16.msra.mxu0 %v131_v2 }
   0x7   :  { %120 = vmatprep.subr.bf16.mxu0 %v134_v0 }
   0xa   :  { %121 = vmatpush3.bf16.msra.mxu0 %v132_v3 }
   0xb   :  { %122 = vmatprep.subr.bf16.mxu0 %v134_v0 }
   0xe   :  { %123 = vmatpush3.bf16.msra.mxu0 %v133_v4 }
  0x11   :  { %125 = vmatmul.mubr.msk.bf16.vlgmr.msra.gmra.mxu0 %vm56_vm1, %v16_v6 }
  0xd1   :  { %v94_v8 = vpop.f32.mrf.mxu0 }
  0xd2   :  { %v95_v9 = vadd.f32 %v105_v7, %v94_v8 }
  0xd3   :  { %v126_v10 = vpop.f32.mrf.mxu0 }
  0xd4   :  { %100 = vst [vmem:[%s180_s3] sm:$0x3] %v95_v9 }
  0xd5   :  { %v97_v11 = vpop.f32.mrf.mxu0 }
  0xd7   :  { %v127_v12 = vpop.f32.mrf.mxu0 }

// kernel: _lambda_.11
= control target key start
LH: loop header
LB: loop body
LE: loop exit
PB: predicated region body
PF: predicated region fallthrough
CT: control target
= control target key end

     0   :  { %s926_s15 = smov 0   ;;  %s1103_s0 = inlined_call_operand.vmem [shape: f32[16,128], index: 0, kind: input, shape index: {}]   ;;  %s1104_s1 = inlined_call_operand.vmem [shape: f32[1,128], index: 1, kind: input, shape index: {}]   ;;  %s1105_s2 = inlined_call_operand.vmem [shape: bf16[128,512], index: 2, kind: input, shape index: {}]   ;;  %s1106_s3 = inlined_call_operand.vmem [shape: bf16[256,128], index: 3, kind: input, shape index: {}]   ;;  %s1107_s4 = inlined_call_operand.vmem [shape: f32[16,128], index: 4, kind: output, shape index: {}]  }
   0x1 LB: > { %s727_s16 = sadd.s32 4294967295, %s898_s15   ;;  %p731_p0 = scmp.ge.s32.totalorder %s898_s15, 1  ;;  %s898_s15 = sphi %s926_s15, %s14_s15  }
   0x2   : > { %p161_p1 = scmp.lt.s32.totalorder %s898_s15, 3 }
   0x4   : > { %p162_p2 = pnand %p731_p0, %p161_p1 }
   0x5   : > { %p185_p3 = scmp.lt.s32.totalorder (!%p162_p2), %s727_s16, 1 }
   0x6   : > { %165 = sbr.rel (%p162_p2) target bundleno = 614 (0x266), region = 36 }
   0xb   : > { %v818_v0 = vld [vmem:[%s1105_s2 + $0xe4] ss:$16 sps:$4 sm:$0xff]   ;;  %v820_v1 = vld [vmem:[%s1105_s2 + $0xec] ss:$16 sps:$4 sm:$0xff]   ;;  %s1109_s16 = smov (!%p185_p3, %s727_s16), 1  ;;  %v900_v29 = vmov 0  }
   0xc   : > { %404 = vmatprep.subr.bf16.mxu0 %v818_v0  ;;  %v822_v2 = vld [vmem:[%s1105_s2 + $0xe0] ss:$16 sps:$4 sm:$0xff]   ;;  %v823_v3 = vld [vmem:[%s1105_s2 + $0xe8] ss:$16 sps:$4 sm:$0xff]   ;;  %445 = vmatprep.subr.bf16.mxu1 %v820_v1  ;;  %v824_v4 = vld [vmem:[%s1105_s2 + $0xc4] ss:$16 sps:$4 sm:$0xff]  }
   0xd   : > { %s732_s27 = sshll.u32 %s1109_s16, 3  ;;  %405 = vmatpush1.bf16.msra.mxu0 %v822_v2  ;;  %446 = vmatpush1.bf16.msra.mxu1 %v823_v3  ;;  %v826_v5 = vld [vmem:[%s1105_s2 + $0xcc] ss:$16 sps:$4 sm:$0xff]   ;;  %v828_v6 = vld [vmem:[%s1105_s2 + $0xc0] ss:$16 sps:$4 sm:$0xff]  }
   0xe   : > { %s188_s8 = scalar_lea.vmem %s1103_s0, %s732_s27  ;;  %406 = vmatprep.subr.bf16.mxu0 %v824_v4  ;;  %v829_v7 = vld [vmem:[%s1105_s2 + $0xc8] ss:$16 sps:$4 sm:$0xff]   ;;  %447 = vmatprep.subr.bf16.mxu1 %v826_v5  ;;  %v830_v10 = vld [vmem:[%s1105_s2 + $0xa4] ss:$16 sps:$4 sm:$0xff]   ;;  %v832_v11 = vld [vmem:[%s1105_s2 + $0xac] ss:$16 sps:$4 sm:$0xff]   ;;  %s192_s29 = scalar_lea.vmem %s1107_s4, %s732_s27 }
   0xf   : > { %v966_v8 = vld [vmem:[%s188_s8] sm:$0xff]  ;;  %v835_v13 = vld [vmem:[%s1105_s2 + $0xa8] ss:$16 sps:$4 sm:$0xff]   ;;  %v838_v15 = vld [vmem:[%s1105_s2 + $0x8c] ss:$16 sps:$4 sm:$0xff]   ;;  %436 = vmatprep.mubr.bf16.mxu0 %v900_v29  ;;  %477 = vmatprep.mubr.bf16.mxu1 %v900_v29 }
  0x10   : > { %v195_v9 = vmul.f32 %v966_v8, %v966_v8  ;;  %v834_v12 = vld [vmem:[%s1105_s2 + $0xa0] ss:$16 sps:$4 sm:$0xff]   ;;  %v836_v14 = vld [vmem:[%s1105_s2 + $0x84] ss:$16 sps:$4 sm:$0xff]   ;;  %v841_v17 = vld [vmem:[%s1105_s2 + $0x88] ss:$16 sps:$4 sm:$0xff]  }
  0x11   : > { %407 = vmatpush1.bf16.msra.mxu0 %v828_v6  ;;  %448 = vmatpush1.bf16.msra.mxu1 %v829_v7  ;;  %v840_v16 = vld [vmem:[%s1105_s2 + $0x80] ss:$16 sps:$4 sm:$0xff]   ;;  %v842_v18 = vld [vmem:[%s1105_s2 + $0x64] ss:$16 sps:$4 sm:$0xff]   ;;  %v844_v19 = vld [vmem:[%s1105_s2 + $0x6c] ss:$16 sps:$4 sm:$0xff]  }
  0x12   : > { %196 = vadd.xlane.f32.xlu0 %v195_v9  ;;  %408 = vmatprep.subr.bf16.mxu0 %v830_v10  ;;  %v846_v20 = vld [vmem:[%s1105_s2 + $0x60] ss:$16 sps:$4 sm:$0xff]   ;;  %v847_v21 = vld [vmem:[%s1105_s2 + $0x68] ss:$16 sps:$4 sm:$0xff]   ;;  %v848_v22 = vld [vmem:[%s1105_s2 + $0x44] ss:$16 sps:$4 sm:$0xff]  }
  0x13   : > { %449 = vmatprep.subr.bf16.mxu1 %v832_v11  ;;  %v850_v23 = vld [vmem:[%s1105_s2 + $0x4c] ss:$16 sps:$4 sm:$0xff]   ;;  %v852_v24 = vld [vmem:[%s1105_s2 + $0x40] ss:$16 sps:$4 sm:$0xff]   ;;  %v853_v25 = vld [vmem:[%s1105_s2 + $0x48] ss:$16 sps:$4 sm:$0xff]  }
  0x14   : > { %v854_v26 = vld [vmem:[%s1105_s2 + $0x24] ss:$16 sps:$4 sm:$0xff]   ;;  %v856_v27 = vld [vmem:[%s1105_s2 + $0x2c] ss:$16 sps:$4 sm:$0xff]   ;;  %v858_v28 = vld [vmem:[%s1105_s2 + $0x20] ss:$16 sps:$4 sm:$0xff]  }
  0x15   : > { %409 = vmatpush1.bf16.msra.mxu0 %v834_v12  ;;  %450 = vmatpush1.bf16.msra.mxu1 %v835_v13  ;;  %v859_v30 = vld [vmem:[%s1105_s2 + $0x28] ss:$16 sps:$4 sm:$0xff]   ;;  %v860_v31 = vld [vmem:[%s1105_s2 + $0x4] ss:$16 sps:$4 sm:$0xff]   ;;  %v862_v32 = vld [vmem:[%s1105_s2 + $0xc] ss:$16 sps:$4 sm:$0xff]  }
  0x16   : > { %410 = vmatprep.subr.bf16.mxu0 %v836_v14  ;;  %451 = vmatprep.subr.bf16.mxu1 %v838_v15  ;;  %v864_v33 = vld [vmem:[%s1105_s2] ss:$16 sps:$4 sm:$0xff]   ;;  %v865_v34 = vld [vmem:[%s1105_s2 + $0x8] ss:$16 sps:$4 sm:$0xff]  }
  0x17   : > { %v734_v39 = vld [vmem:[%s1104_s1] ss:$0 sm:$0xff]  ;;  %v866_v43 = vld [vmem:[%s1106_s3 + $0x78] sm:$0xff]   ;;  %v868_v45 = vld [vmem:[%s1106_s3 + $0x70] sm:$0xff]  }
  0x18   : > { %v867_v44 = vld [vmem:[%s1106_s3 + $0x38] sm:$0xff]   ;;  %v869_v46 = vld [vmem:[%s1106_s3 + $0x30] sm:$0xff]   ;;  %v870_v47 = vld [vmem:[%s1106_s3 + $0x68] sm:$0xff]  }
  0x19   : > { %411 = vmatpush1.bf16.msra.mxu0 %v840_v16  ;;  %452 = vmatpush1.bf16.msra.mxu1 %v841_v17  ;;  %v871_v48 = vld [vmem:[%s1106_s3 + $0x28] sm:$0xff]   ;;  %v872_v49 = vld [vmem:[%s1106_s3 + $0x60] sm:$0xff]   ;;  %v874_v51 = vld [vmem:[%s1106_s3 + $0x58] sm:$0xff]  }
  0x1a   : > { %412 = vmatprep.subr.bf16.mxu0 %v842_v18  ;;  %453 = vmatprep.subr.bf16.mxu1 %v844_v19  ;;  %v873_v50 = vld [vmem:[%s1106_s3 + $0x20] sm:$0xff]   ;;  %v875_v52 = vld [vmem:[%s1106_s3 + $0x18] sm:$0xff]   ;;  %v876_v53 = vld [vmem:[%s1106_s3 + $0x50] sm:$0xff]  }
  0x1b   : > { %v877_v54 = vld [vmem:[%s1106_s3 + $0x10] sm:$0xff]   ;;  %v878_v55 = vld [vmem:[%s1106_s3 + $0x48] sm:$0xff]   ;;  %v880_v57 = vld [vmem:[%s1106_s3 + $0x40] sm:$0xff]  }
  0x1c   : > { %v879_v56 = vld [vmem:[%s1106_s3 + $0x8] sm:$0xff]   ;;  %v881_v58 = vld [vmem:[%s1106_s3] sm:$0xff]  }
  0x1d   : > { %413 = vmatpush1.bf16.msra.mxu0 %v846_v20  ;;  %454 = vmatpush1.bf16.msra.mxu1 %v847_v21 }
  0x1e   : > { %414 = vmatprep.subr.bf16.mxu0 %v848_v22  ;;  %455 = vmatprep.subr.bf16.mxu1 %v850_v23 }
  0x21   : > { %415 = vmatpush1.bf16.msra.mxu0 %v852_v24  ;;  %456 = vmatpush1.bf16.msra.mxu1 %v853_v25 }
  0x22   : > { %416 = vmatprep.subr.bf16.mxu0 %v854_v26  ;;  %457 = vmatprep.subr.bf16.mxu1 %v856_v27 }
  0x25   : > { %417 = vmatpush1.bf16.msra.mxu0 %v858_v28  ;;  %458 = vmatpush1.bf16.msra.mxu1 %v859_v30 }
  0x26   : > { %418 = vmatprep.subr.bf16.mxu0 %v860_v31  ;;  %459 = vmatprep.subr.bf16.mxu1 %v862_v32 }
  0x29   : > { %419 = vmatpush1.bf16.msra.mxu0 %v864_v33  ;;  %460 = vmatpush1.bf16.msra.mxu1 %v865_v34 }
  0x2a   : > { %787 = vmatprep.subr.bf16.mxu0 %v866_v43 }
  0x9b   : > { %v197_v35 = vpop.xlane.xlu0 %196 }
  0x9c   : > { %v199_v36 = vmul.f32 0.0078125, %v197_v35 }
  0x9e   : > { %v200_v37 = vadd.f32 1e-06, %v199_v36 }
  0xa0   : > { %882 = vrsqrt.f32 %v200_v37 }
  0xad   : > { %v883_v38 = vpop.eup %882 }
  0xae   : > { %v202_v40 = vmul.f32 %v883_v38, %v966_v8 }
  0xb0   : > { %v210_v41 = vmul.f32 %v734_v39, %v202_v40 }
  0xb2   : > { %v211_v42 = vpack.c.bf16 %v210_v41, %v210_v41 }
  0xb4   : > { %437 = vmatmul.mubr.bf16.vlgmr.msra.gmra.mxu0 %v211_v42  ;;  %478 = vmatmul.mubr.bf16.vlgmr.msra.gmra.mxu1 %v211_v42 }
  0xb5   : > { %788 = vmatpush3.bf16.msra.mxu0 %v867_v44 }
  0xb6   : > { %789 = vmatprep.subr.bf16.mxu0 %v868_v45 }
  0xb9   : > { %790 = vmatpush3.bf16.msra.mxu0 %v869_v46 }
  0xba   : > { %791 = vmatprep.subr.bf16.mxu0 %v870_v47 }
  0xbd   : > { %792 = vmatpush3.bf16.msra.mxu0 %v871_v48 }
  0xbe   : > { %793 = vmatprep.subr.bf16.mxu0 %v872_v49 }
  0xc1   : > { %794 = vmatpush3.bf16.msra.mxu0 %v873_v50 }
  0xc2   : > { %795 = vmatprep.subr.bf16.mxu0 %v874_v51 }
  0xc5   : > { %796 = vmatpush3.bf16.msra.mxu0 %v875_v52 }
  0xc6   : > { %797 = vmatprep.subr.bf16.mxu0 %v876_v53 }
  0xc9   : > { %798 = vmatpush3.bf16.msra.mxu0 %v877_v54 }
  0xca   : > { %799 = vmatprep.subr.bf16.mxu0 %v878_v55 }
  0xcd   : > { %800 = vmatpush3.bf16.msra.mxu0 %v879_v56 }
  0xce   : > { %801 = vmatprep.subr.bf16.mxu0 %v880_v57 }
  0xd1   : > { %802 = vmatpush3.bf16.msra.mxu0 %v881_v58 }
 0x174   : > { %v438_v59 = vpop.f32.mrf.mxu0  ;;  %v479_v60 = vpop.f32.mrf.mxu1 }
 0x175   : > { %v767_v61 = vmul.f32 -1.442695, %v438_v59 }
 0x176   : > { %v440_v62 = vpop.f32.mrf.mxu0  ;;  %v481_v63 = vpop.f32.mrf.mxu1 }
 0x177   : > { %884 = vpow2.f32 %v767_v61  ;;  %v768_v0 = vmul.f32 -1.442695, %v440_v62 }
 0x178   : > { %v442_v1 = vpop.f32.mrf.mxu0  ;;  %v483_v2 = vpop.f32.mrf.mxu1 }
 0x179   : > { %886 = vpow2.f32 %v768_v0 }
 0x17a   : > { %v443_v3 = vpop.f32.mrf.mxu0  ;;  %v484_v4 = vpop.f32.mrf.mxu1 }
 0x184   : > { %v885_v5 = vpop.eup %884 }
 0x185   : > { %v492_v6 = vadd.f32 1.0, %v885_v5 }
 0x186   : > { %v887_v7 = vpop.eup %886 }
 0x187   : > { %888 = vrcp.f32 %v492_v6  ;;  %v493_v9 = vadd.f32 1.0, %v887_v7 }
 0x189   : > { %890 = vrcp.f32 %v493_v9 }
 0x194   : > { %v889_v10 = vpop.eup %888 }
 0x195   : > { %v498_v11 = vmul.f32 %v889_v10, %v438_v59 }
 0x196   : > { %v891_v12 = vpop.eup %890 }
 0x197   : > { %v499_v13 = vmul.f32 %v891_v12, %v440_v62  ;;  %v500_v14 = vmul.f32 %v498_v11, %v479_v60 }
 0x199   : > { %v501_v15 = vmul.f32 %v499_v13, %v481_v63  ;;  %v502_v17 = vpack.c.bf16 %v500_v14, %v500_v14 }
 0x19b   : > { %v503_v16 = vpack.c.bf16 %v501_v15, %v501_v15 }
 0x19d   : > { %664 = vmatprep.mubr.bf16.mxu0 %v503_v16 }
 0x19e   : > { %665 = vmatmul.mubr.bf16.vlgmr.msra.gmra.mxu0 %v502_v17 }
 0x25e   : > { %v803_v18 = vpop.f32.mrf.mxu0 }
 0x260   : > { %v804_v19 = vpop.f32.mrf.mxu0 }
 0x261   : > { %v805_v20 = vadd.f32 %v804_v19, %v803_v18 }
 0x262   : > { %v806_v21 = vpop.f32.mrf.mxu0 }
 0x263   : > { %v672_v22 = vadd.f32 %v805_v20, %v966_v8 }
 0x264   : > { %v807_v23 = vpop.f32.mrf.mxu0 }
 0x265   : > { %673 = vst [vmem:[%s192_s29] sm:$0xff] %v672_v22 }
 0x266 PF: > { %s14_s15 = sadd.s32 1, %s898_s15  }
 0x267   : > { %p11_p4 = scmp.ge.s32.totalorder %s14_s15, 4  }
 0x269   :  { %13 = sbr.rel (!%p11_p4) target bundleno = 1 (0x1), region = 66 }

// kernel: _lambda_.9
= control target key start
LH: loop header
LB: loop body
LE: loop exit
PB: predicated region body
PF: predicated region fallthrough
CT: control target
= control target key end

     0   :  { %s626_s12 = smov 0   ;;  %s722_s0 = inlined_call_operand.vmem [shape: f32[16,128], index: 0, kind: input, shape index: {}]   ;;  %s723_s1 = inlined_call_operand.vmem [shape: f32[1,128], index: 1, kind: input, shape index: {}]   ;;  %s724_s2 = inlined_call_operand.vmem [shape: bf16[128,384], index: 2, kind: input, shape index: {}]   ;;  %s725_s3 = inlined_call_operand.vmem [shape: f32[16,384], index: 3, kind: output, shape index: {}]  }
   0x1 LB: > { %s486_s13 = sadd.s32 4294967295, %s601_s12   ;;  %p490_p0 = scmp.ge.s32.totalorder %s601_s12, 1  ;;  %s601_s12 = sphi %s626_s12, %s13_s12  }
   0x2   : > { %p136_p1 = scmp.lt.s32.totalorder %s601_s12, 3 }
   0x4   : > { %p137_p2 = pnand %p490_p0, %p136_p1 }
   0x5   : > { %p159_p3 = scmp.lt.s32.totalorder (!%p137_p2), %s486_s13, 1 }
   0x6   : > { %140 = sbr.rel (%p137_p2) target bundleno = 379 (0x17b), region = 32 }
   0xb   : > { %v561_v0 = vld [vmem:[%s724_s2 + $0xac] ss:$12 sps:$4 sm:$0xff]   ;;  %v603_v1 = vmov 0.0   ;;  %v563_v2 = vld [vmem:[%s724_s2 + $0xa8] ss:$12 sps:$4 sm:$0xff]   ;;  %s727_s13 = smov (!%p159_p3, %s486_s13), 1 }
   0xc   : > { %529 = vmatprep.subr.bf16.mxu1 %v603_v1  ;;  %347 = vmatprep.subr.bf16.mxu0 %v561_v0  ;;  %v564_v3 = vld [vmem:[%s724_s2 + $0xb0] ss:$12 sps:$4 sm:$0xff]   ;;  %v565_v4 = vld [vmem:[%s724_s2 + $0x94] ss:$12 sps:$4 sm:$0xff]   ;;  %s491_s24 = sshll.u32 %s727_s13, 3  ;;  %v604_v22 = vmov 0  }
   0xd   : > { %348 = vmatpush1.bf16.msra.mxu0 %v563_v2  ;;  %v567_v5 = vld [vmem:[%s724_s2 + $0x90] ss:$12 sps:$4 sm:$0xff]   ;;  %530 = vmatpush3.bf16.msra.mxu1 %v564_v3  ;;  %v568_v6 = vld [vmem:[%s724_s2 + $0x98] ss:$12 sps:$4 sm:$0xff]   ;;  %s162_s29 = scalar_lea.vmem %s722_s0, %s491_s24  ;;  %v572_v11 = vld [vmem:[%s724_s2 + $0x80] ss:$12 sps:$4 sm:$0xff]  }
   0xe   : > { %349 = vmatprep.subr.bf16.mxu0 %v565_v4  ;;  %531 = vmatprep.subr.bf16.mxu1 %v603_v1  ;;  %v169_v7 = vld [vmem:[%s162_s29] sm:$0xff]  ;;  %v569_v9 = vld [vmem:[%s724_s2 + $0x7c] ss:$12 sps:$4 sm:$0xff]   ;;  %v577_v15 = vld [vmem:[%s724_s2 + $0x4c] ss:$12 sps:$4 sm:$0xff]   ;;  %vm605_vm0 = vmmov 0  }
   0xf   : > { %v170_v8 = vmul.f32 %v169_v7, %v169_v7  ;;  %v571_v10 = vld [vmem:[%s724_s2 + $0x78] ss:$12 sps:$4 sm:$0xff]   ;;  %v575_v13 = vld [vmem:[%s724_s2 + $0x60] ss:$12 sps:$4 sm:$0xff]   ;;  %v576_v14 = vld [vmem:[%s724_s2 + $0x68] ss:$12 sps:$4 sm:$0xff]   ;;  %379 = vmatprep.mubr.bf16.mxu0 %v604_v22  ;;  %545 = vmatprep.mubr.msk.bf16.mxu1 %vm605_vm0, %v603_v1 }
  0x10   : > { %v573_v12 = vld [vmem:[%s724_s2 + $0x64] ss:$12 sps:$4 sm:$0xff]   ;;  %v579_v16 = vld [vmem:[%s724_s2 + $0x48] ss:$12 sps:$4 sm:$0xff]   ;;  %v588_v24 = vld [vmem:[%s724_s2 + $0x20] ss:$12 sps:$4 sm:$0xff]  }
  0x11   : > { %350 = vmatpush1.bf16.msra.mxu0 %v567_v5  ;;  %532 = vmatpush3.bf16.msra.mxu1 %v568_v6  ;;  %v580_v17 = vld [vmem:[%s724_s2 + $0x50] ss:$12 sps:$4 sm:$0xff]   ;;  %v581_v18 = vld [vmem:[%s724_s2 + $0x34] ss:$12 sps:$4 sm:$0xff]   ;;  %v584_v20 = vld [vmem:[%s724_s2 + $0x38] ss:$12 sps:$4 sm:$0xff]  }
  0x12   : > { %171 = vadd.xlane.f32.xlu0 %v170_v8  ;;  %533 = vmatprep.subr.bf16.mxu1 %v603_v1  ;;  %v583_v19 = vld [vmem:[%s724_s2 + $0x30] ss:$12 sps:$4 sm:$0xff]   ;;  %v587_v23 = vld [vmem:[%s724_s2 + $0x18] ss:$12 sps:$4 sm:$0xff]   ;;  %v591_v26 = vld [vmem:[%s724_s2] ss:$12 sps:$4 sm:$0xff]  }
  0x13   : > { %351 = vmatprep.subr.bf16.mxu0 %v569_v9  ;;  %v585_v21 = vld [vmem:[%s724_s2 + $0x1c] ss:$12 sps:$4 sm:$0xff]   ;;  %v589_v25 = vld [vmem:[%s724_s2 + $0x4] ss:$12 sps:$4 sm:$0xff]   ;;  %v493_v32 = vld [vmem:[%s723_s1] ss:$0 sm:$0xff] }
  0x14   : > { %v592_v27 = vld [vmem:[%s724_s2 + $0x8] ss:$12 sps:$4 sm:$0xff]   ;;  %s549_s18 = smul.u32 24, %s727_s13 }
  0x15   : > { %352 = vmatpush1.bf16.msra.mxu0 %v571_v10  ;;  %534 = vmatpush3.bf16.msra.mxu1 %v572_v11 }
  0x16   : > { %535 = vmatprep.subr.bf16.mxu1 %v603_v1  ;;  %353 = vmatprep.subr.bf16.mxu0 %v573_v12  ;;  %s167_s21 = scalar_lea.vmem %s725_s3, %s549_s18 }
  0x19   : > { %354 = vmatpush1.bf16.msra.mxu0 %v575_v13  ;;  %536 = vmatpush3.bf16.msra.mxu1 %v576_v14 }
  0x1a   : > { %355 = vmatprep.subr.bf16.mxu0 %v577_v15  ;;  %537 = vmatprep.subr.bf16.mxu1 %v603_v1 }
  0x1d   : > { %356 = vmatpush1.bf16.msra.mxu0 %v579_v16  ;;  %538 = vmatpush3.bf16.msra.mxu1 %v580_v17 }
  0x1e   : > { %357 = vmatprep.subr.bf16.mxu0 %v581_v18  ;;  %539 = vmatprep.subr.bf16.mxu1 %v603_v1 }
  0x21   : > { %358 = vmatpush1.bf16.msra.mxu0 %v583_v19  ;;  %540 = vmatpush3.bf16.msra.mxu1 %v584_v20 }
  0x22   : > { %359 = vmatprep.subr.bf16.mxu0 %v585_v21  ;;  %541 = vmatprep.subr.bf16.mxu1 %v603_v1 }
  0x25   : > { %360 = vmatpush1.bf16.msra.mxu0 %v587_v23  ;;  %542 = vmatpush3.bf16.msra.mxu1 %v588_v24 }
  0x26   : > { %361 = vmatprep.subr.bf16.mxu0 %v589_v25  ;;  %543 = vmatprep.subr.bf16.mxu1 %v603_v1 }
  0x29   : > { %362 = vmatpush1.bf16.msra.mxu0 %v591_v26  ;;  %544 = vmatpush3.bf16.msra.mxu1 %v592_v27 }
  0x9b   : > { %v172_v28 = vpop.xlane.xlu0 %171 }
  0x9c   : > { %v174_v29 = vmul.f32 0.0078125, %v172_v28 }
  0x9e   : > { %v175_v30 = vadd.f32 1e-06, %v174_v29 }
  0xa0   : > { %593 = vrsqrt.f32 %v175_v30 }
  0xad   : > { %v594_v31 = vpop.eup %593 }
  0xae   : > { %v177_v33 = vmul.f32 %v594_v31, %v169_v7 }
  0xb0   : > { %v185_v34 = vmul.f32 %v493_v32, %v177_v33 }
  0xb2   : > { %v186_v35 = vpack.c.bf16 %v185_v34, %v185_v34 }
  0xb4   : > { %380 = vmatmul.mubr.bf16.vlgmr.msra.gmra.mxu0 %v186_v35  ;;  %546 = vmatmul.mubr.bf16.vlgmr.msra.gmra.mxu1 %v186_v35 }
 0x174   : > { %v381_v36 = vpop.f32.mrf.mxu0  ;;  %v422_v37 = vpop.f32.mrf.mxu1 }
 0x175   : > { %428 = vst [vmem:[%s167_s21] sm:$0xff] %v381_v36  ;;  %430 = vst [vmem:[%s167_s21 + $0x10] sm:$0xff] %v422_v37 }
 0x176   : > { %v383_v38 = vpop.f32.mrf.mxu0  ;;  %v547_v39 = vpop.f32.mrf.mxu1 }
 0x177   : > { %429 = vst [vmem:[%s167_s21 + $0x8] sm:$0xff] %v383_v38 }
 0x178   : > { %v385_v40 = vpop.f32.mrf.mxu0  ;;  %v425_v41 = vpop.f32.mrf.mxu1 }
 0x17a   : > { %v386_v42 = vpop.f32.mrf.mxu0  ;;  %v548_v43 = vpop.f32.mrf.mxu1 }
 0x17b PF: > { %s13_s12 = sadd.s32 1, %s601_s12  }
 0x17c   : > { %p10_p4 = scmp.ge.s32.totalorder %s13_s12, 4  }
 0x17e   :  { %12 = sbr.rel (!%p10_p4) target bundleno = 1 (0x1), region = 62 }

// kernel: _lambda_.10
= control target key start
LH: loop header
LB: loop body
LE: loop exit
PB: predicated region body
PF: predicated region fallthrough
CT: control target
= control target key end

     0   :  { %s2024_s21 = smov 0   ;;  %s2295_s0 = inlined_call_operand.vmem [shape: f32[16,384], index: 0, kind: input, shape index: {}]   ;;  %s2296_s1 = inlined_call_operand.vmem [shape: f32[16,128], index: 1, kind: input, shape index: {}]   ;;  %s2297_s2 = inlined_call_operand.vmem [shape: f32[2,8,8], index: 2, kind: input, shape index: {}]   ;;  %s2298_s3 = inlined_call_operand.vmem [shape: f32[8,16], index: 3, kind: input, shape index: {}]   ;;  %s2299_s4 = inlined_call_operand.vmem [shape: f32[8,16], index: 4, kind: input, shape index: {}]   ;;  %s2300_s5 = inlined_call_operand.vmem [shape: bf16[128,128], index: 5, kind: input, shape index: {}]   ;;  %s2301_s6 = inlined_call_operand.vmem [shape: f32[16,128], index: 6, kind: output, shape index: {}]  }
   0x1 LB: > { %s1759_s22 = sadd.s32 4294967295, %s1978_s21   ;;  %p1763_p0 = scmp.ge.s32.totalorder %s1978_s21, 1  ;;  %s1978_s21 = sphi %s2024_s21, %s16_s21  }
   0x2   : > { %p230_p1 = scmp.lt.s32.totalorder %s1978_s21, 3 }
   0x4   : > { %p231_p2 = pnand %p1763_p0, %p230_p1 }
   0x5   : > { %p267_p3 = scmp.lt.s32.totalorder (!%p231_p2), %s1759_s22, 1  ;;  %s1980_s27 = smov (!%p231_p2), 16  }
   0x6   : > { %234 = sbr.rel (%p231_p2) target bundleno = 2712 (0xa98), region = 44  ;;  %s1983_s8 = smov (!%p231_p2), 112  }
   0x7   : > { %s1984_s9 = smov (!%p231_p2), 32   ;;  %s1985_s10 = smov (!%p231_p2), 48  }
   0x8   : > { %s1986_s15 = smov (!%p231_p2), 80   ;;  %s1987_s16 = smov (!%p231_p2), 96  }
   0x9   : > { %s1988_s19 = smov (!%p231_p2), 64  }
   0xb   : > { %v2035_v0 = vld [vmem:[%s2299_s4] sm:$0xff]  ;;  %s2303_s22 = smov (!%p267_p3, %s1759_s22), 1  ;;  %v1981_v6 = vmov 0.0   ;;  %vm1982_vm0 = vmmov 0   ;;  %vm334_vm1 = vcmask 130048   ;;  %vm486_vm2 = vcmask 64512  }
   0xc   : > { %v2040_v1 = vld [vmem:[%s2298_s3] sm:$0xff]  ;;  %294 = vrot.lane.b32.xlu1 %v2035_v0, %s1980_s27  ;;  %s1930_s28 = smul.u32 24, %s2303_s22  ;;  %1838 = vmatprep.subr.mxu1 %v1981_v6  ;;  %s2111_s11 = sshll.u32 %s2303_s22, 3  ;;  %v1948_v59 = vld [vmem:[%s2300_s5 + $0x8] sm:$0xff]   ;;  %vm588_vm3 = vcmask 261120  }
   0xd   : > { %304 = vrot.lane.b32.xlu0 %v2040_v1, %s1980_s27  ;;  %1848 = vmatprep.subr.mxu0 %v1981_v6  ;;  %s279_s14 = scalar_lea.vmem %s2297_s2, %s2111_s11  ;;  %s275_s30 = scalar_lea.vmem %s2296_s1, %s2111_s11 }
   0xe   : > { %s2052_s7 = scalar_lea.vmem %s2295_s0, %s1930_s28  ;;  %1840 = vmatprep.mubr.msk.f32.mxu1 %vm1982_vm0, %v1981_v6  ;;  %1850 = vmatprep.mubr.msk.f32.mxu0 %vm1982_vm0, %v1981_v6  ;;  %v2117_v34 = vld [vmem:[%s279_s14] sm:$0xff]  ;;  %s283_s17 = scalar_lea.vmem %s2301_s6, %s2111_s11 }
   0xf   : > { %v2055_v2 = vld [vmem:[%s2052_s7 + $0x8] sm:$0xff]  ;;  %v2058_v3 = vld [vmem:[%s2052_s7] sm:$0xff]  ;;  %v2131_v58 = vld [vmem:[%s2052_s7 + $0x10] sm:$0xff] }
  0x10   : > { %v322_v4 = vmul.f32 %v2055_v2, %v2035_v0  ;;  %v308_v5 = vmul.f32 %v2058_v3, %v2035_v0  ;;  %v314_v18 = vmul.f32 %v2055_v2, %v2040_v1  ;;  %v292_v20 = vmul.f32 %v2058_v3, %v2040_v1  ;;  %1849 = vmatpush3.msra.mxu0 %v2131_v58 }
  0x11   : > { %1861 = vmatprep.subr.mxu0 %v1981_v6 }
  0x12   : > { %324 = vrot.lane.b32.xlu0 %v322_v4, %s1980_s27  ;;  %310 = vrot.lane.b32.xlu1 %v308_v5, %s1980_s27 }
  0x7e   : > { %v295_v7 = vpop.permute.xlu1 %294 }
  0x7f   : > { %v315_v8 = vmul.f32 %v295_v7, %v2055_v2  ;;  %v297_v9 = vmul.f32 %v295_v7, %v2058_v3  ;;  %v305_v10 = vpop.permute.xlu0 %304 }
  0x80   : > { %v321_v11 = vmul.f32 %v305_v10, %v2055_v2  ;;  %v307_v15 = vmul.f32 %v305_v10, %v2058_v3 }
  0x81   : > { %317 = vrot.lane.b32.xlu1 %v315_v8, %s1983_s8  ;;  %v1949_v8 = vld [vmem:[%s2300_s5] sm:$0xff]  }
  0x84   : > { %v325_v12 = vpop.permute.xlu0 %324  ;;  %v311_v14 = vpop.permute.xlu1 %310 }
  0x85   : > { %299 = vrot.lane.b32.xlu1 %v297_v9, %s1983_s8  ;;  %v327_v13 = vadd.f32 %v325_v12, %v321_v11  ;;  %v313_v16 = vadd.f32 %v311_v14, %v307_v15 }
  0x87   : > { %332 = vrot.lane.b32.xlu0 %v327_v13, %s1983_s8 }
  0x8b   : > { %329 = vrot.lane.b32.xlu0 %v313_v16, %s1983_s8 }
  0x8f   : > { %650 = vrot.lane.b32.xlu0 %v2035_v0, %s1984_s9 }
  0x93   : > { %637 = vrot.lane.b32.xlu0 %v2035_v0, %s1985_s10 }
  0x97   : > { %646 = vrot.lane.b32.xlu0 %v2040_v1, %s1985_s10 }
  0xf3   : > { %v318_v17 = vpop.permute.xlu1 %317 }
  0xf4   : > { %v320_v21 = vsub.f32 %v314_v18, %v318_v17 }
  0xf7   : > { %v300_v22 = vpop.permute.xlu1 %299 }
  0xf8   : > { %v302_v24 = vsub.f32 %v292_v20, %v300_v22 }
  0xf9   : > { %v333_v19 = vpop.permute.xlu0 %332 }
  0xfa   : > { %1839 = vmatpush3.xpose.msk.msra.mxu1 %vm334_vm1, %v333_v19 }
  0xfb   : > { %1843 = vmatprep.subr.mxu1 %v1981_v6 }
  0xfd   : > { %v330_v23 = vpop.permute.xlu0 %329 }
  0xfe   : > { %1841 = vmatmul.mubr.msk.f32.vlgmr.msra.gmra.mxu1 %vm334_vm1, %v330_v23 }
  0xff   : > { %1844 = vmatpush3.xpose.msk.msra.mxu1 %vm334_vm1, %v320_v21  ;;  %1845 = vmatprep.mubr.msk.f32.mxu1 %vm1982_vm0, %v1981_v6 }
 0x100   : > { %1853 = vmatprep.subr.bf16.mxu1 %v1981_v6 }
 0x101   : > { %v651_v25 = vpop.permute.xlu0 %650 }
 0x102   : > { %1846 = vmatmul.mubr.msk.f32.vlgmr.msra.gmra.mxu1 %vm334_vm1, %v302_v24  ;;  %v667_v26 = vmul.f32 %v651_v25, %v2055_v2  ;;  %v653_v27 = vmul.f32 %v651_v25, %v2058_v3 }
 0x103   : > { %1857 = vmatprep.mubr.msk.bf16.mxu1 %vm1982_vm0, %v1981_v6  ;;  %1854 = vmatpush3.bf16.msra.mxu1 %v1948_v59 }
 0x104   : > { %669 = vrot.lane.b32.xlu0 %v667_v26, %s1980_s27  ;;  %1855 = vmatprep.subr.bf16.mxu1 %v1981_v6 }
 0x105   : > { %v638_v28 = vpop.permute.xlu0 %637 }
 0x106   : > { %v660_v29 = vmul.f32 %v638_v28, %v2055_v2  ;;  %v640_v30 = vmul.f32 %v638_v28, %v2058_v3 }
 0x107   : > { %1856 = vmatpush3.bf16.msra.mxu1 %v1949_v8 }
 0x108   : > { %633 = vrot.lane.b32.xlu0 %v2040_v1, %s1984_s9  ;;  %1876 = vmatprep.subr.bf16.mxu1 %v1981_v6 }
 0x109   : > { %v647_v39 = vpop.permute.xlu0 %646 }
 0x10a   : > { %v666_v40 = vmul.f32 %v647_v39, %v2055_v2  ;;  %v649_v44 = vmul.f32 %v647_v39, %v2058_v3 }
 0x10c   : > { %655 = vrot.lane.b32.xlu0 %v653_v27, %s1980_s27 }
 0x110   : > { %662 = vrot.lane.b32.xlu0 %v660_v29, %s1983_s8 }
 0x114   : > { %642 = vrot.lane.b32.xlu0 %v640_v30, %s1983_s8 }
 0x176   : > { %v670_v41 = vpop.permute.xlu0 %669 }
 0x177   : > { %v672_v42 = vadd.f32 %v670_v41, %v666_v40 }
 0x17a   : > { %v634_v43 = vpop.permute.xlu0 %633 }
 0x17b   : > { %v659_v46 = vmul.f32 %v634_v43, %v2055_v2  ;;  %v636_v49 = vmul.f32 %v634_v43, %v2058_v3 }
 0x17e   : > { %v656_v45 = vpop.permute.xlu0 %655 }
 0x17f   : > { %v658_v47 = vadd.f32 %v656_v45, %v649_v44 }
 0x182   : > { %v663_v48 = vpop.permute.xlu0 %662 }
 0x183   : > { %v665_v50 = vsub.f32 %v659_v46, %v663_v48 }
 0x186   : > { %v643_v51 = vpop.permute.xlu0 %642 }
 0x187   : > { %v645_v52 = vsub.f32 %v636_v49, %v643_v51 }
 0x1be   : > { %v405_v31 = vpop.f32.mrf.mxu1 }
 0x1c0   : > { %v1842_v32 = vpop.f32.mrf.mxu1 }
 0x1c2   : > { %v481_v33 = vpop.f32.mrf.mxu1 }
 0x1c3   : > { %v482_v35 = vadd.f32 %v481_v33, %v405_v31 }
 0x1c4   : > { %v1847_v36 = vpop.f32.mrf.mxu1 }
 0x1c5   : > { %v485_v37 = vadd.f32 %v482_v35, %v2117_v34 }
 0x1c7   : > { %v487_v38 = vsel %vm486_vm2, %v485_v37, -inf }
 0x1c8   : > { %488 = vmax.xlane.f32.xlu1 %v487_v38 }
 0x1d9   : > { %677 = vrot.lane.b32.xlu1 %v672_v42, %s1986_s15 }
 0x1dd   : > { %674 = vrot.lane.b32.xlu1 %v658_v47, %s1986_s15 }
 0x1e1   : > { %757 = vrot.lane.b32.xlu1 %v665_v50, %s1987_s16  ;;  %v1950_v50 = vld [vmem:[%s2300_s5 + $0x18] sm:$0xff]  }
 0x1e5   : > { %754 = vrot.lane.b32.xlu1 %v645_v52, %s1987_s16 }
 0x251   : > { %v489_v53 = vpop.xlane.xlu1 %488 }
 0x252   : > { %v490_v54 = vsub.f32 %v485_v37, %v489_v53 }
 0x254   : > { %v491_v55 = vmul.f32 1.442695, %v490_v54 }
 0x255   : > { %v678_v61 = vpop.permute.xlu1 %677 }
 0x256   : > { %1956 = vpow2.f32 %v491_v55 }
 0x259   : > { %v675_v62 = vpop.permute.xlu1 %674 }
 0x25d   : > { %v758_v5 = vpop.permute.xlu1 %757 }
 0x261   : > { %v755_v7 = vpop.permute.xlu1 %754 }
 0x263   : > { %v1957_v56 = vpop.eup %1956 }
 0x264   : > { %v493_v57 = vsel %vm486_vm2, %v1957_v56, 0.0 }
 0x265   : > { %494 = vadd.xlane.f32.xlu0 %v493_v57  ;;  %v1951_v57 = vld [vmem:[%s2300_s5 + $0x10] sm:$0xff]  }
 0x27b   : > { %1000 = vrot.lane.b32.xlu0 %v2035_v0, %s1988_s19 }
 0x27f   : > { %987 = vrot.lane.b32.xlu0 %v2035_v0, %s1986_s15 }
 0x283   : > { %996 = vrot.lane.b32.xlu0 %v2040_v1, %s1986_s15 }
 0x2ee   : > { %v495_v60 = vpop.xlane.xlu0 %494 }
 0x2ef   : > { %1958 = vrcp.f32 %v495_v60 }
 0x2f2   : > { %v1001_v9 = vpop.permute.xlu0 %1000 }
 0x2f3   : > { %v1017_v10 = vmul.f32 %v1001_v9, %v2055_v2  ;;  %v1003_v11 = vmul.f32 %v1001_v9, %v2058_v3 }
 0x2f5   : > { %1019 = vrot.lane.b32.xlu0 %v1017_v10, %s1980_s27 }
 0x2f6   : > { %v988_v12 = vpop.permute.xlu0 %987 }
 0x2f7   : > { %v990_v13 = vmul.f32 %v988_v12, %v2058_v3  ;;  %v1010_v24 = vmul.f32 %v988_v12, %v2055_v2 }
 0x2f9   : > { %983 = vrot.lane.b32.xlu0 %v2040_v1, %s1988_s19 }
 0x2fa   : > { %v997_v25 = vpop.permute.xlu0 %996 }
 0x2fb   : > { %v1016_v26 = vmul.f32 %v997_v25, %v2055_v2  ;;  %v999_v30 = vmul.f32 %v997_v25, %v2058_v3 }
 0x2fc   : > { %v1959_v63 = vpop.eup %1958 }
 0x2fd   : > { %v497_v4 = vmul.f32 %v1959_v63, %v1957_v56  ;;  %1005 = vrot.lane.b32.xlu0 %v1003_v11, %s1980_s27 }
 0x2ff   : > { %1851 = vmatmul.mubr.msk.f32.vlgmr.msra.gmra.mxu0 %vm486_vm2, %v497_v4 }
 0x300   : > { %1862 = vmatpush3.xpose.msk.msra.mxu0 %vm334_vm1, %v678_v61  ;;  %1863 = vmatprep.mubr.msk.f32.mxu0 %vm1982_vm0, %v1981_v6 }
 0x301   : > { %1866 = vmatprep.subr.mxu0 %v1981_v6  ;;  %992 = vrot.lane.b32.xlu0 %v990_v13, %s1983_s8 }
 0x303   : > { %1864 = vmatmul.mubr.msk.f32.vlgmr.msra.gmra.mxu0 %vm334_vm1, %v675_v62 }
 0x304   : > { %1867 = vmatpush3.xpose.msk.msra.mxu0 %vm334_vm1, %v758_v5  ;;  %1868 = vmatprep.mubr.msk.f32.mxu0 %vm1982_vm0, %v1981_v6 }
 0x305   : > { %1871 = vmatprep.subr.mxu0 %v1981_v6 }
 0x307   : > { %1869 = vmatmul.mubr.msk.f32.vlgmr.msra.gmra.mxu0 %vm334_vm1, %v755_v7 }
 0x308   : > { %1873 = vmatprep.mubr.msk.f32.mxu0 %vm1982_vm0, %v1981_v6 }
 0x367   : > { %v1020_v27 = vpop.permute.xlu0 %1019 }
 0x368   : > { %v1022_v28 = vadd.f32 %v1020_v27, %v1016_v26 }
 0x36b   : > { %v984_v29 = vpop.permute.xlu0 %983 }
 0x36c   : > { %v1009_v36 = vmul.f32 %v984_v29, %v2055_v2  ;;  %v986_v38 = vmul.f32 %v984_v29, %v2058_v3 }
 0x36f   : > { %v1006_v31 = vpop.permute.xlu0 %1005 }
 0x370   : > { %v1008_v32 = vadd.f32 %v1006_v31, %v999_v30 }
 0x373   : > { %v993_v40 = vpop.permute.xlu0 %992 }
 0x374   : > { %v995_v42 = vsub.f32 %v986_v38, %v993_v40 }
 0x3bf   : > { %v567_v14 = vpop.f32.mrf.mxu0 }
 0x3c0   : > { %v571_v15 = vpack.c.bf16 %v567_v14, %v567_v14 }
 0x3c1   : > { %v1852_v16 = vpop.f32.mrf.mxu0 }
 0x3c2   : > { %1858 = vmatmul.mubr.msk.bf16.vlgmr.msra.gmra.mxu1 %vm588_vm3, %v571_v15 }
 0x3c3   : > { %v749_v17 = vpop.f32.mrf.mxu0  ;;  %1880 = vmatprep.mubr.msk.bf16.mxu1 %vm1982_vm0, %v1981_v6  ;;  %1877 = vmatpush3.bf16.msra.mxu1 %v1950_v50 }
 0x3c4   : > { %1878 = vmatprep.subr.bf16.mxu1 %v1981_v6 }
 0x3c5   : > { %v1865_v18 = vpop.f32.mrf.mxu0 }
 0x3c7   : > { %v829_v19 = vpop.f32.mrf.mxu0  ;;  %1879 = vmatpush3.bf16.msra.mxu1 %v1951_v57 }
 0x3c8   : > { %v830_v20 = vadd.f32 %v829_v19, %v749_v17  ;;  %1894 = vmatprep.subr.mxu1 %v1981_v6 }
 0x3c9   : > { %v1870_v21 = vpop.f32.mrf.mxu0 }
 0x3ca   : > { %v833_v22 = vadd.f32 %v830_v20, %v2117_v34 }
 0x3cc   : > { %v834_v23 = vsel %vm486_vm2, %v833_v22, -inf }
 0x3cd   : > { %835 = vmax.xlane.f32.xlu1 %v834_v23 }
 0x3de   : > { %1012 = vrot.lane.b32.xlu1 %v1010_v24, %s1983_s8 }
 0x3e2   : > { %846 = vrot.lane.b32.xlu1 %v2131_v58, %s1987_s16 }
 0x3e6   : > { %1027 = vrot.lane.b32.xlu1 %v1022_v28, %s1985_s10 }
 0x3ea   : > { %1024 = vrot.lane.b32.xlu1 %v1008_v32, %s1985_s10 }
 0x456   : > { %v836_v33 = vpop.xlane.xlu1 %835 }
 0x457   : > { %v837_v35 = vsub.f32 %v833_v22, %v836_v33 }
 0x459   : > { %v838_v37 = vmul.f32 1.442695, %v837_v35 }
 0x45a   : > { %v1013_v39 = vpop.permute.xlu1 %1012 }
 0x45b   : > { %1960 = vpow2.f32 %v838_v37  ;;  %v1015_v41 = vsub.f32 %v1009_v36, %v1013_v39 }
 0x45d   : > { %1107 = vrot.lane.b32.xlu1 %v1015_v41, %s1988_s19  ;;  %v1952_v41 = vld [vmem:[%s2300_s5 + $0x28] sm:$0xff]  }
 0x45e   : > { %v847_v43 = vpop.permute.xlu1 %846 }
 0x45f   : > { %1872 = vmatpush3.msra.mxu0 %v847_v43 }
 0x460   : > { %1884 = vmatprep.subr.mxu0 %v1981_v6 }
 0x461   : > { %1104 = vrot.lane.b32.xlu1 %v995_v42, %s1988_s19 }
 0x462   : > { %v1028_v52 = vpop.permute.xlu1 %1027 }
 0x465   : > { %1349 = vrot.lane.b32.xlu1 %v2035_v0, %s1987_s16 }
 0x466   : > { %v1025_v53 = vpop.permute.xlu1 %1024 }
 0x468   : > { %v1961_v44 = vpop.eup %1960 }
 0x469   : > { %v840_v45 = vsel %vm486_vm2, %v1961_v44, 0.0  ;;  %1336 = vrot.lane.b32.xlu1 %v2035_v0, %s1983_s8 }
 0x46a   : > { %841 = vadd.xlane.f32.xlu0 %v840_v45 }
 0x482   : > { %v2193_v46 = vpop.f32.mrf.mxu1 }
 0x484   : > { %v1859_v47 = vpop.f32.mrf.mxu1 }
 0x486   : > { %v629_v48 = vpop.f32.mrf.mxu1 }
 0x488   : > { %v1860_v49 = vpop.f32.mrf.mxu1 }
 0x489   : > { %v1953_v49 = vld [vmem:[%s2300_s5 + $0x20] sm:$0xff]  }
 0x4cf   : > { %v1108_v0 = vpop.permute.xlu1 %1107 }
 0x4d3   : > { %v1105_v56 = vpop.permute.xlu1 %1104 }
 0x4d7   : > { %v1350_v59 = vpop.permute.xlu1 %1349 }
 0x4d8   : > { %v1366_v60 = vmul.f32 %v1350_v59, %v2055_v2  ;;  %v1352_v61 = vmul.f32 %v1350_v59, %v2058_v3 }
 0x4da   : > { %1368 = vrot.lane.b32.xlu1 %v1366_v60, %s1980_s27 }
 0x4db   : > { %v1337_v62 = vpop.permute.xlu1 %1336 }
 0x4dc   : > { %v1359_v63 = vmul.f32 %v1337_v62, %v2055_v2  ;;  %v1339_v4 = vmul.f32 %v1337_v62, %v2058_v3 }
 0x4de   : > { %1332 = vrot.lane.b32.xlu1 %v2040_v1, %s1987_s16 }
 0x4e2   : > { %1354 = vrot.lane.b32.xlu1 %v1352_v61, %s1980_s27 }
 0x4e6   : > { %1361 = vrot.lane.b32.xlu1 %v1359_v63, %s1983_s8 }
 0x4ea   : > { %1341 = vrot.lane.b32.xlu1 %v1339_v4, %s1983_s8 }
 0x4ee   : > { %1195 = vrot.lane.b32.xlu1 %v2131_v58, %s1988_s19 }
 0x4f3   : > { %v842_v51 = vpop.xlane.xlu0 %841 }
 0x4f4   : > { %1962 = vrcp.f32 %v842_v51 }
 0x501   : > { %v1963_v54 = vpop.eup %1962 }
 0x502   : > { %v844_v55 = vmul.f32 %v1963_v54, %v1961_v44 }
 0x504   : > { %1874 = vmatmul.mubr.msk.f32.vlgmr.msra.gmra.mxu0 %vm486_vm2, %v844_v55 }
 0x505   : > { %1885 = vmatpush3.xpose.msk.msra.mxu0 %vm334_vm1, %v1028_v52  ;;  %1886 = vmatprep.mubr.msk.f32.mxu0 %vm1982_vm0, %v1981_v6 }
 0x506   : > { %1889 = vmatprep.subr.mxu0 %v1981_v6 }
 0x508   : > { %1887 = vmatmul.mubr.msk.f32.vlgmr.msra.gmra.mxu0 %vm334_vm1, %v1025_v53 }
 0x509   : > { %1890 = vmatpush3.xpose.msk.msra.mxu0 %vm334_vm1, %v1108_v0  ;;  %1891 = vmatprep.mubr.msk.f32.mxu0 %vm1982_vm0, %v1981_v6 }
 0x50a   : > { %1899 = vmatprep.subr.bf16.mxu0 %v1981_v6 }
 0x50c   : > { %1892 = vmatmul.mubr.msk.f32.vlgmr.msra.gmra.mxu0 %vm334_vm1, %v1105_v56 }
 0x50d   : > { %1903 = vmatprep.mubr.msk.bf16.mxu0 %vm1982_vm0, %v1981_v6  ;;  %1900 = vmatpush3.bf16.msra.mxu0 %v1952_v41 }
 0x50e   : > { %1901 = vmatprep.subr.bf16.mxu0 %v1981_v6 }
 0x511   : > { %1902 = vmatpush3.bf16.msra.mxu0 %v1953_v49 }
 0x512   : > { %1922 = vmatprep.subr.bf16.mxu0 %v1981_v6 }
 0x54c   : > { %v1369_v16 = vpop.permute.xlu1 %1368 }
 0x550   : > { %v1333_v17 = vpop.permute.xlu1 %1332 }
 0x551   : > { %v1358_v19 = vmul.f32 %v1333_v17, %v2055_v2  ;;  %v1335_v21 = vmul.f32 %v1333_v17, %v2058_v3 }
 0x554   : > { %v1355_v18 = vpop.permute.xlu1 %1354 }
 0x558   : > { %v1362_v20 = vpop.permute.xlu1 %1361 }
 0x559   : > { %v1364_v22 = vsub.f32 %v1358_v19, %v1362_v20 }
 0x55c   : > { %v1342_v23 = vpop.permute.xlu1 %1341 }
 0x55d   : > { %v1344_v24 = vsub.f32 %v1335_v21, %v1342_v23 }
 0x560   : > { %v1196_v25 = vpop.permute.xlu1 %1195 }
 0x5c4   : > { %v918_v5 = vpop.f32.mrf.mxu0 }
 0x5c5   : > { %v922_v7 = vpack.c.bf16 %v918_v5, %v918_v5 }
 0x5c6   : > { %v1875_v8 = vpop.f32.mrf.mxu0 }
 0x5c7   : > { %1881 = vmatmul.mubr.msk.bf16.vlgmr.msra.gmra.mxu1 %vm588_vm3, %v922_v7 }
 0x5c8   : > { %v1099_v9 = vpop.f32.mrf.mxu0  ;;  %1896 = vmatprep.mubr.msk.f32.mxu1 %vm1982_vm0, %v1981_v6  ;;  %1895 = vmatpush3.msra.mxu1 %v1196_v25 }
 0x5c9   : > { %1907 = vmatprep.subr.mxu1 %v1981_v6 }
 0x5ca   : > { %v1888_v10 = vpop.f32.mrf.mxu0 }
 0x5cb   : > { %v1955_v10 = vld [vmem:[%s2300_s5 + $0x30] sm:$0xff]  }
 0x5cc   : > { %v1179_v11 = vpop.f32.mrf.mxu0 }
 0x5cd   : > { %v1180_v12 = vadd.f32 %v1179_v11, %v1099_v9 }
 0x5ce   : > { %v1893_v13 = vpop.f32.mrf.mxu0 }
 0x5cf   : > { %v1183_v14 = vadd.f32 %v1180_v12, %v2117_v34 }
 0x5d1   : > { %v1184_v15 = vsel %vm486_vm2, %v1183_v14, -inf }
 0x5d2   : > { %1185 = vmax.xlane.f32.xlu0 %v1184_v15 }
 0x5e8   : > { %1345 = vrot.lane.b32.xlu0 %v2040_v1, %s1983_s8 }
 0x65b   : > { %v1186_v26 = vpop.xlane.xlu0 %1185 }
 0x65c   : > { %v1187_v27 = vsub.f32 %v1183_v14, %v1186_v26 }
 0x65e   : > { %v1188_v28 = vmul.f32 1.442695, %v1187_v27 }
 0x65f   : > { %v1346_v1 = vpop.permute.xlu0 %1345 }
 0x660   : > { %1964 = vpow2.f32 %v1188_v28  ;;  %v1348_v29 = vmul.f32 %v1346_v1, %v2058_v3  ;;  %v1365_v30 = vmul.f32 %v1346_v1, %v2055_v2  ;;  %v288_v3 = vld [vmem:[%s275_s30] sm:$0xff] }
 0x661   : > { %v632_v2 = vadd.f32 %v2193_v46, %v288_v3 }
 0x662   : > { %v1371_v31 = vadd.f32 %v1369_v16, %v1365_v30  ;;  %v1357_v32 = vadd.f32 %v1355_v18, %v1348_v29 }
 0x664   : > { %1376 = vrot.lane.b32.xlu1 %v1371_v31, %s1980_s27 }
 0x668   : > { %1373 = vrot.lane.b32.xlu1 %v1357_v32, %s1980_s27 }
 0x66c   : > { %1456 = vrot.lane.b32.xlu1 %v1364_v22, %s1984_s9 }
 0x66d   : > { %v1965_v33 = vpop.eup %1964 }
 0x66e   : > { %v1190_v35 = vsel %vm486_vm2, %v1965_v33, 0.0 }
 0x66f   : > { %1191 = vadd.xlane.f32.xlu0 %v1190_v35 }
 0x670   : > { %1453 = vrot.lane.b32.xlu1 %v1344_v24, %s1984_s9 }
 0x687   : > { %v976_v36 = vpop.f32.mrf.mxu1 }
 0x688   : > { %v982_v37 = vadd.f32 %v976_v36, %v632_v2 }
 0x689   : > { %v1882_v38 = vpop.f32.mrf.mxu1 }
 0x68b   : > { %v979_v39 = vpop.f32.mrf.mxu1 }
 0x68d   : > { %v1883_v40 = vpop.f32.mrf.mxu1 }
 0x6d6   : > { %v1377_v43 = vpop.permute.xlu1 %1376 }
 0x6da   : > { %v1374_v44 = vpop.permute.xlu1 %1373 }
 0x6de   : > { %v1457_v46 = vpop.permute.xlu1 %1456 }
 0x6e2   : > { %v1454_v48 = vpop.permute.xlu1 %1453 }
 0x6f8   : > { %v1192_v42 = vpop.xlane.xlu0 %1191 }
 0x6f9   : > { %1966 = vrcp.f32 %v1192_v42 }
 0x706   : > { %v1967_v45 = vpop.eup %1966 }
 0x707   : > { %v1194_v47 = vmul.f32 %v1967_v45, %v1965_v33 }
 0x709   : > { %1897 = vmatmul.mubr.msk.f32.vlgmr.msra.gmra.mxu1 %vm486_vm2, %v1194_v47 }
 0x70a   : > { %1908 = vmatpush3.xpose.msk.msra.mxu1 %vm334_vm1, %v1377_v43  ;;  %1909 = vmatprep.mubr.msk.f32.mxu1 %vm1982_vm0, %v1981_v6 }
 0x70b   : > { %1912 = vmatprep.subr.mxu1 %v1981_v6 }
 0x70d   : > { %1910 = vmatmul.mubr.msk.f32.vlgmr.msra.gmra.mxu1 %vm334_vm1, %v1374_v44 }
 0x70e   : > { %1913 = vmatpush3.xpose.msk.msra.mxu1 %vm334_vm1, %v1457_v46  ;;  %1914 = vmatprep.mubr.msk.f32.mxu1 %vm1982_vm0, %v1981_v6 }
 0x70f   : > { %1917 = vmatprep.subr.mxu1 %v1981_v6 }
 0x711   : > { %1915 = vmatmul.mubr.msk.f32.vlgmr.msra.gmra.mxu1 %vm334_vm1, %v1454_v48 }
 0x712   : > { %1919 = vmatprep.mubr.msk.f32.mxu1 %vm1982_vm0, %v1981_v6 }
 0x7c9   : > { %v1267_v50 = vpop.f32.mrf.mxu1 }
 0x7ca   : > { %v1271_v51 = vpack.c.bf16 %v1267_v50, %v1267_v50 }
 0x7cb   : > { %v1898_v52 = vpop.f32.mrf.mxu1 }
 0x7cc   : > { %1904 = vmatmul.mubr.msk.bf16.vlgmr.msra.gmra.mxu0 %vm588_vm3, %v1271_v51 }
 0x7cd   : > { %v1448_v53 = vpop.f32.mrf.mxu1  ;;  %1926 = vmatprep.mubr.msk.bf16.mxu0 %vm1982_vm0, %v1981_v6 }
 0x7cf   : > { %v1911_v54 = vpop.f32.mrf.mxu1 }
 0x7d1   : > { %v1528_v55 = vpop.f32.mrf.mxu1 }
 0x7d2   : > { %v1529_v0 = vadd.f32 %v1528_v55, %v1448_v53 }
 0x7d3   : > { %v1916_v56 = vpop.f32.mrf.mxu1 }
 0x7d4   : > { %v1532_v57 = vadd.f32 %v1529_v0, %v2117_v34  ;;  %v1954_v34 = vld [vmem:[%s2300_s5 + $0x38] sm:$0xff]  }
 0x7d5   : > { %1923 = vmatpush3.bf16.msra.mxu0 %v1954_v34 }
 0x7d6   : > { %v1533_v59 = vsel %vm486_vm2, %v1532_v57, -inf  ;;  %1924 = vmatprep.subr.bf16.mxu0 %v1981_v6 }
 0x7d7   : > { %1534 = vmax.xlane.f32.xlu1 %v1533_v59 }
 0x7d9   : > { %1925 = vmatpush3.bf16.msra.mxu0 %v1955_v10 }
 0x860   : > { %v1535_v60 = vpop.xlane.xlu1 %1534 }
 0x861   : > { %v1536_v61 = vsub.f32 %v1532_v57, %v1535_v60 }
 0x863   : > { %v1537_v62 = vmul.f32 1.442695, %v1536_v61 }
 0x865   : > { %1968 = vpow2.f32 %v1537_v62 }
 0x872   : > { %v1969_v63 = vpop.eup %1968 }
 0x873   : > { %v1539_v4 = vsel %vm486_vm2, %v1969_v63, 0.0 }
 0x874   : > { %1540 = vadd.xlane.f32.xlu0 %v1539_v4 }
 0x88a   : > { %1544 = vrot.lane.b32.xlu0 %v2131_v58, %s1984_s9 }
 0x88c   : > { %v1325_v5 = vpop.f32.mrf.mxu0 }
 0x88d   : > { %v1331_v7 = vadd.f32 %v1325_v5, %v982_v37 }
 0x88e   : > { %v1905_v8 = vpop.f32.mrf.mxu0 }
 0x890   : > { %v1328_v9 = vpop.f32.mrf.mxu0 }
 0x892   : > { %v1906_v11 = vpop.f32.mrf.mxu0 }
 0x8fd   : > { %v1541_v12 = vpop.xlane.xlu0 %1540 }
 0x8fe   : > { %1970 = vrcp.f32 %v1541_v12 }
 0x901   : > { %v1545_v58 = vpop.permute.xlu0 %1544 }
 0x902   : > { %1918 = vmatpush3.msra.mxu1 %v1545_v58 }
 0x90b   : > { %v1971_v13 = vpop.eup %1970 }
 0x90c   : > { %v1543_v14 = vmul.f32 %v1971_v13, %v1969_v63 }
 0x90e   : > { %1920 = vmatmul.mubr.msk.f32.vlgmr.msra.gmra.mxu1 %vm486_vm2, %v1543_v14 }
 0x9ce   : > { %v1616_v15 = vpop.f32.mrf.mxu1 }
 0x9cf   : > { %v1620_v16 = vpack.c.bf16 %v1616_v15, %v1616_v15 }
 0x9d0   : > { %v1921_v17 = vpop.f32.mrf.mxu1 }
 0x9d1   : > { %1927 = vmatmul.mubr.msk.bf16.vlgmr.msra.gmra.mxu0 %vm588_vm3, %v1620_v16 }
 0xa91   : > { %v1674_v6 = vpop.f32.mrf.mxu0 }
 0xa92   : > { %v1680_v18 = vadd.f32 %v1674_v6, %v1331_v7 }
 0xa93   : > { %v1928_v19 = vpop.f32.mrf.mxu0 }
 0xa94   : > { %1681 = vst [vmem:[%s283_s17] sm:$0xff] %v1680_v18 }
 0xa95   : > { %v1677_v20 = vpop.f32.mrf.mxu0 }
 0xa97   : > { %v1929_v21 = vpop.f32.mrf.mxu0 }
 0xa98 PF: > { %s16_s21 = sadd.s32 1, %s1978_s21  }
 0xa99   : > { %p13_p4 = scmp.ge.s32.totalorder %s16_s21, 4  }
 0xa9b   :  { %15 = sbr.rel (!%p13_p4) target bundleno = 1 (0x1), region = 80 }

// kernel: _lambda_.15
= control target key start
LH: loop header
LB: loop body
LE: loop exit
PB: predicated region body
PF: predicated region fallthrough
CT: control target
= control target key end

     0   :  { %9 = vsyncpa [#allocation8], 0  ;;  %s801_s15 = smov 0   ;;  %s803_s16 = smov 0   ;;  %s919_s0 = inlined_call_operand.vmem [shape: f32[14,128], index: 0, kind: input, shape index: {}]   ;;  %s920_s1 = inlined_call_operand.vmem [shape: f32[1,128], index: 1, kind: input, shape index: {}]   ;;  %s921_s2 = inlined_call_operand.vmem [shape: bf16[128,512], index: 2, kind: input, shape index: {}]   ;;  %s922_s3 = inlined_call_operand.vmem [shape: s32[14,1], index: 3, kind: input, shape index: {}]   ;;  %s923_s4 = inlined_call_operand.hbm [shape: f32[1,1], index: 4, kind: output, shape index: {}]  }
   0x1   :  { %s805_s17 = smov 0  }
   0x2 LB: > { %s817_s18 = sadd.s32 4294967295, %s768_s17   ;;  %s820_s19 = sadd.s32 1, %s768_s17   ;;  %s768_s17 = sphi %s805_s17, %s926_s17   ;;  %s764_s16 = sphi %s803_s16, %s925_s16   ;;  %s760_s15 = sphi %s801_s15, %s924_s15  }
   0x3   : > { %s61_s20 = ssub.s32 %s768_s17, %s820_s19  ;;  %s64_s21 = sadd.s32 1, %s764_s16 }
   0x4   : > { %p62_p0 = scmp.eq.s32.totalorder %s61_s20, 0  ;;  %p71_p1 = scmp.ne.s32.totalorder %s764_s16, %s760_s15 }
   0x5   : > { %p72_p2 = scmp.eq.s32.totalorder %s768_s17, 0  ;;  %p604_p4 = scmp.ge.s32.totalorder %s768_s17, 4 }
   0x6   : > { %s829_s22 = scalar_select %p62_p0, %s764_s16, %s64_s21  }
   0x7   : > { %p73_p3 = por %p72_p2, %p71_p1  ;;  %148 = sbr.rel (%p604_p4) target bundleno = 27 (0x1b), region = 28 }
   0xc   : > { %151 = sbr.rel (!%p73_p3) target bundleno = 27 (0x1b), region = 32  ;;  %s153_s23 = sand.u32 (%p73_p3), 1, %s764_s16  }
   0xd   : > { %s606_s24 = sshll.u32 (%p73_p3), %s768_s17, 2  ;;  %s605_s25 = sshll.u32 (%p73_p3), %s153_s23, 6 }
   0xe   : > { %s837_s28 = scalar_lea.vmem (%p73_p3), %s921_s2, %s606_s24  ;;  %s155_s29 = scalar_lea.vmem (%p73_p3), [#allocation6], %s605_s25 }
   0xf   : > { %v174_v0 = vld [vmem:[%s837_s28] sm:$0xf] (%p73_p3)  ;;  %v176_v1 = vld [vmem:[%s837_s28 + $0x10] sm:$0xf] (%p73_p3) }
  0x10   : > { %175 = vst [vmem:[%s155_s29] sm:$0xf] (%p73_p3), %v174_v0  ;;  %177 = vst [vmem:[%s155_s29 + $0x4] sm:$0xf] (%p73_p3), %v176_v1  ;;  %v178_v2 = vld [vmem:[%s837_s28 + $0x20] sm:$0xf] (%p73_p3) }
  0x11   : > { %v180_v3 = vld [vmem:[%s837_s28 + $0x30] sm:$0xf]  ;;  %v182_v4 = vld [vmem:[%s837_s28 + $0x40] sm:$0xf]  ;;  %179 = vst [vmem:[%s155_s29 + $0x8] sm:$0xf] %v178_v2 }
  0x12   : > { %181 = vst [vmem:[%s155_s29 + $0xc] sm:$0xf] %v180_v3  ;;  %183 = vst [vmem:[%s155_s29 + $0x10] sm:$0xf] %v182_v4  ;;  %v184_v5 = vld [vmem:[%s837_s28 + $0x50] sm:$0xf] }
  0x13   : > { %v186_v6 = vld [vmem:[%s837_s28 + $0x60] sm:$0xf]  ;;  %v188_v7 = vld [vmem:[%s837_s28 + $0x70] sm:$0xf]  ;;  %185 = vst [vmem:[%s155_s29 + $0x14] sm:$0xf] %v184_v5 }
  0x14   : > { %187 = vst [vmem:[%s155_s29 + $0x18] sm:$0xf] %v186_v6  ;;  %189 = vst [vmem:[%s155_s29 + $0x1c] sm:$0xf] %v188_v7  ;;  %v190_v8 = vld [vmem:[%s837_s28 + $0x80] sm:$0xf] }
  0x15   : > { %v192_v9 = vld [vmem:[%s837_s28 + $0x90] sm:$0xf]  ;;  %v194_v10 = vld [vmem:[%s837_s28 + $0xa0] sm:$0xf]  ;;  %191 = vst [vmem:[%s155_s29 + $0x20] sm:$0xf] %v190_v8 }
  0x16   : > { %193 = vst [vmem:[%s155_s29 + $0x24] sm:$0xf] %v192_v9  ;;  %195 = vst [vmem:[%s155_s29 + $0x28] sm:$0xf] %v194_v10  ;;  %v196_v11 = vld [vmem:[%s837_s28 + $0xb0] sm:$0xf] }
  0x17   : > { %v198_v12 = vld [vmem:[%s837_s28 + $0xc0] sm:$0xf]  ;;  %v200_v13 = vld [vmem:[%s837_s28 + $0xd0] sm:$0xf]  ;;  %197 = vst [vmem:[%s155_s29 + $0x2c] sm:$0xf] %v196_v11 }
  0x18   : > { %199 = vst [vmem:[%s155_s29 + $0x30] sm:$0xf] %v198_v12  ;;  %201 = vst [vmem:[%s155_s29 + $0x34] sm:$0xf] %v200_v13  ;;  %v202_v14 = vld [vmem:[%s837_s28 + $0xe0] sm:$0xf] }
  0x19   : > { %v204_v15 = vld [vmem:[%s837_s28 + $0xf0] sm:$0xf]  ;;  %203 = vst [vmem:[%s155_s29 + $0x38] sm:$0xf] %v202_v14 }
  0x1a   : > { %205 = vst [vmem:[%s155_s29 + $0x3c] sm:$0xf] %v204_v15 }
  0x1b PF: > { %p607_p5 = scmp.ge.s32.totalorder %s768_s17, 1  ;;  %p260_p6 = scmp.lt.s32.totalorder %s768_s17, 5 }
  0x1d   : > { %p261_p7 = pnand %p607_p5, %p260_p6 }
  0x1e   : > { %s267_s30 = sand.u32 (!%p261_p7), 1, %s760_s15   ;;  %p609_p8 = scmp.ne.s32.totalorder (!%p261_p7), %s817_s18, 0 }
  0x1f   : > { %264 = sbr.rel (%p261_p7) target bundleno = 1117 (0x45d), region = 73  ;;  %s608_s5 = sshll.u32 (!%p261_p7), %s267_s30, 6 }
  0x20   : > { %s858_s6 = scalar_lea.vmem (!%p261_p7), [#allocation6], %s608_s5 }
  0x24   : > { %291 = sbr.rel (%p609_p8) target bundleno = 209 (0xd1), region = 81 }
  0x29   : > { %v292_v16 = vld [vmem:[%s919_s0] sm:$0xff]  ;;  %v293_v17 = vld [vmem:[%s919_s0 + $0x8] sm:$0x3f]  ;;  %vm298_vm0 = vcmask 1045504   ;;  %vm322_vm1 = vcmask 7168   ;;  %vm324_vm2 = vcmask 5120  }
  0x2a   : > { %v294_v18 = vmul.f32 %v292_v16, %v292_v16  ;;  %v295_v19 = vmul.f32 %v293_v17, %v293_v17  ;;  %v770_v21 = vmov -inf   ;;  %v771_v22 = vmov 0.0   ;;  %v610_v30 = vld [vmem:[%s920_s1] ss:$0 sm:$0xff] }
  0x2b   : > { %323 = vst.msk [vmem:[#allocation3] sm:$0xff] %vm322_vm1, %v770_v21  ;;  %326 = vst.msk [vmem:[#allocation4] sm:$0xff] %vm322_vm1, %v771_v22 }
  0x2c   : > { %296 = vadd.xlane.f32.xlu0 %v294_v18  ;;  %v299_v20 = vsel %vm298_vm0, %v295_v19, 0.0  ;;  %325 = vst.msk [vmem:[#allocation3 + $0x8] sm:$0x3f] %vm324_vm2, %v770_v21  ;;  %327 = vst.msk [vmem:[#allocation4 + $0x8] sm:$0x3f] %vm324_vm2, %v771_v22 }
  0x2d   : > { %328 = vst.msk [vmem:[#allocation5] sm:$0xff] %vm322_vm1, %v771_v22 }
  0x2e   : > { %329 = vst.msk [vmem:[#allocation5 + $0x8] sm:$0x3f] %vm324_vm2, %v771_v22 }
  0x30   : > { %300 = vadd.xlane.f32.xlu0 %v299_v20 }
  0xb5   : > { %v297_v23 = vpop.xlane.xlu0 %296 }
  0xb6   : > { %v303_v24 = vmul.f32 0.0078125, %v297_v23 }
  0xb8   : > { %v305_v25 = vadd.f32 1e-06, %v303_v24 }
  0xb9   : > { %v301_v26 = vpop.xlane.xlu0 %300 }
  0xba   : > { %692 = vrsqrt.f32 %v305_v25  ;;  %v304_v27 = vmul.f32 0.0078125, %v301_v26 }
  0xbc   : > { %v306_v28 = vadd.f32 1e-06, %v304_v27 }
  0xbe   : > { %694 = vrsqrt.f32 %v306_v28 }
  0xc7   : > { %v693_v29 = vpop.eup %692 }
  0xc8   : > { %v309_v31 = vmul.f32 %v693_v29, %v292_v16 }
  0xca   : > { %v318_v32 = vmul.f32 %v610_v30, %v309_v31 }
  0xcb   : > { %v695_v33 = vpop.eup %694 }
  0xcc   : > { %320 = vst [vmem:[#allocation2] sm:$0xff] %v318_v32  ;;  %v310_v34 = vmul.f32 %v695_v33, %v293_v17 }
  0xce   : > { %v319_v35 = vmul.f32 %v610_v30, %v310_v34 }
  0xd0   : > { %321 = vst [vmem:[#allocation2 + $0x8] sm:$0x3f] %v319_v35 }
  0xd1 PF: > { %v698_v36 = vld [vmem:[%s858_s6 + $0x38] sm:$0xff]   ;;  %v772_v37 = vmov 0.0   ;;  %v699_v38 = vld [vmem:[%s858_s6 + $0x30] sm:$0xff]   ;;  %vm773_vm3 = vmmov 0   ;;  %v700_v39 = vld [vmem:[%s858_s6 + $0x28] sm:$0xff]   ;;  %v774_v48 = vmov 0   ;;  %v438_v0 = vlaneseq }
  0xd2   : > { %634 = vmatprep.subr.bf16.mxu0 %v772_v37  ;;  %650 = vmatprep.mubr.msk.bf16.mxu0 %vm773_vm3, %v772_v37  ;;  %v701_v40 = vld [vmem:[%s858_s6 + $0x20] sm:$0xff]   ;;  %v702_v41 = vld [vmem:[%s858_s6 + $0x18] sm:$0xff]   ;;  %v703_v42 = vld [vmem:[%s858_s6 + $0x10] sm:$0xff]   ;;  %vm459_vm4 = vcmask 1045504   ;;  %vm467_vm5 = vcmask 5120   ;;  %vm465_vm6 = vcmask 7168  }
  0xd3   : > { %635 = vmatpush3.bf16.msra.mxu0 %v698_v36  ;;  %v704_v43 = vld [vmem:[%s858_s6 + $0x8] sm:$0xff]   ;;  %v705_v44 = vld [vmem:[%s858_s6] sm:$0xff]   ;;  %697 = vset.pattern.permute.xlu0 %v774_v48  ;;  %v470_v55 = vld [vmem:[#allocation3 + $0x8] sm:$0x3f]  ;;  %s619_s20 = sshll.u32 %s817_s18, 7  ;;  %v439_v1 = vand.u32 127, %v438_v0 }
  0xd4   : > { %636 = vmatprep.subr.bf16.mxu0 %v772_v37  ;;  %v330_v45 = vld [vmem:[#allocation2] sm:$0xff]  ;;  %696 = vset.pattern.permute.xlu1 %v774_v48  ;;  %v444_v54 = vld [vmem:[%s922_s3 + $0x8] sm:$0x3f]  ;;  %v469_v58 = vld [vmem:[#allocation3] sm:$0xff]  ;;  %v441_v3 = vstv %s619_s20  ;;  %p620_p9 = scmp.ne.s32.totalorder %s817_s18, 3 }
  0xd5   : > { %v443_v63 = vld [vmem:[%s922_s3] sm:$0xff]  ;;  %v442_v6 = vadd.s32 %v441_v3, %v439_v1  ;;  %v453_v20 = vld [vmem:[#allocation5] sm:$0xff]  ;;  %v454_v23 = vld [vmem:[#allocation5 + $0x8] sm:$0x3f] }
  0xd6   : > { %v479_v27 = vld [vmem:[#allocation4 + $0x8] sm:$0x3f]  ;;  %v478_v30 = vld [vmem:[#allocation4] sm:$0xff] }
  0xd7   : > { %637 = vmatpush3.bf16.msra.mxu0 %v699_v38  ;;  %v331_v46 = vld [vmem:[#allocation2 + $0x8] sm:$0x3f] }
  0xd8   : > { %638 = vmatprep.subr.bf16.mxu0 %v772_v37  ;;  %v332_v47 = vpack.c.bf16 %v331_v46, %v330_v45 }
  0xdb   : > { %639 = vmatpush3.bf16.msra.mxu0 %v700_v39 }
  0xdc   : > { %640 = vmatprep.subr.bf16.mxu0 %v772_v37 }
  0xdf   : > { %641 = vmatpush3.bf16.msra.mxu0 %v701_v40 }
  0xe0   : > { %642 = vmatprep.subr.bf16.mxu0 %v772_v37 }
  0xe3   : > { %643 = vmatpush3.bf16.msra.mxu0 %v702_v41 }
  0xe4   : > { %644 = vmatprep.subr.bf16.mxu0 %v772_v37 }
  0xe7   : > { %645 = vmatpush3.bf16.msra.mxu0 %v703_v42 }
  0xe8   : > { %646 = vmatprep.subr.bf16.mxu0 %v772_v37 }
  0xeb   : > { %647 = vmatpush3.bf16.msra.mxu0 %v704_v43 }
  0xec   : > { %648 = vmatprep.subr.bf16.mxu0 %v772_v37 }
  0xef   : > { %649 = vmatpush3.bf16.msra.mxu0 %v705_v44 }
  0xf2   : > { %651 = vmatmul.mubr.bf16.vlgmr.msra.gmra.mxu0 %v332_v47 }
 0x1b2   : > { %v431_v49 = vpop.f32.mrf.mxu0 }
 0x1b4   : > { %v652_v50 = vpop.f32.mrf.mxu0 }
 0x1b6   : > { %v434_v51 = vpop.f32.mrf.mxu0 }
 0x1b7   : > { %v473_v52 = vsel %vm459_vm4, %v434_v51, -inf }
 0x1b8   : > { %474 = vmax.xlane.f32.xlu0 %v473_v52  ;;  %v653_v53 = vpop.f32.mrf.mxu0 }
 0x1bc   : > { %471 = vmax.xlane.f32.xlu0 %v431_v49 }
 0x1d2   : > { %449 = vperm.xlu0 %697, %v444_v54  }
 0x241   : > { %v475_v56 = vpop.xlane.xlu0 %474 }
 0x242   : > { %v477_v57 = vmax.f32 %v470_v55, %v475_v56 }
 0x244   : > { %v481_v59 = vsub.f32 %v470_v55, %v477_v57  ;;  %514 = vst.msk [vmem:[#allocation3 + $0x8] sm:$0x3f] %vm467_vm5, %v477_v57  ;;  %495 = vperm.xlu1 %696, %v477_v57  }
 0x245   : > { %v472_v60 = vpop.xlane.xlu0 %471 }
 0x246   : > { %v476_v61 = vmax.f32 %v469_v58, %v472_v60  ;;  %v484_v18 = vmul.f32 1.442695, %v481_v59 }
 0x248   : > { %v480_v62 = vsub.f32 %v469_v58, %v476_v61  ;;  %513 = vst.msk [vmem:[#allocation3] sm:$0xff] %vm465_vm6, %v476_v61  ;;  %490 = vperm.xlu1 %696, %v476_v61  }
 0x24a   : > { %v482_v19 = vmul.f32 1.442695, %v480_v62 }
 0x24c   : > { %446 = vperm.xlu1 %696, %v443_v63  }
 0x24d   : > { %v450_v8 = vpop.permute.xlu0 %449 }
 0x24e   : > { %vm452_vm7 = vcmp.eq.s32.totalorder %v442_v6, %v450_v8 }
 0x24f   : > { %v456_v13 = vsel %vm452_vm7, %v434_v51, 0.0 }
 0x250   : > { %v460_v14 = vsel %vm459_vm4, %v456_v13, 0.0 }
 0x2bf   : > { %v496_v2 = vpop.permute.xlu1 %495 }
 0x2c0   : > { %v499_v4 = vsub.f32 %v434_v51, %v496_v2 }
 0x2c2   : > { %v502_v5 = vmul.f32 1.442695, %v499_v4 }
 0x2c3   : > { %v491_v7 = vpop.permute.xlu1 %490 }
 0x2c4   : > { %706 = vpow2.f32 %v502_v5  ;;  %v498_v9 = vsub.f32 %v431_v49, %v491_v7 }
 0x2c6   : > { %v500_v10 = vmul.f32 1.442695, %v498_v9 }
 0x2c7   : > { %v447_v11 = vpop.permute.xlu1 %446 }
 0x2c8   : > { %708 = vpow2.f32 %v500_v10  ;;  %vm451_vm8 = vcmp.eq.s32.totalorder %v442_v6, %v447_v11 }
 0x2c9   : > { %v455_v12 = vsel %vm451_vm8, %v431_v49, 0.0  ;;  %710 = vpow2.f32 %v484_v18 }
 0x2ca   : > { %457 = vadd.xlane.f32.xlu1 %v455_v12  ;;  %712 = vpow2.f32 %v482_v19 }
 0x2ce   : > { %461 = vadd.xlane.f32.xlu1 %v460_v14 }
 0x2d1   : > { %v707_v15 = vpop.eup %706 }
 0x2d2   : > { %v506_v16 = vsel %vm459_vm4, %v707_v15, 0.0 }
 0x2d3   : > { %507 = vadd.xlane.f32.xlu1 %v506_v16 }
 0x2d5   : > { %v709_v17 = vpop.eup %708 }
 0x2d6   : > { %504 = vadd.xlane.f32.xlu0 %v709_v17  ;;  %v711_v25 = vpop.eup %710 }
 0x2d7   : > { %v713_v28 = vpop.eup %712  ;;  %v487_v29 = vmul.f32 %v711_v25, %v479_v27 }
 0x2d8   : > { %v486_v33 = vmul.f32 %v713_v28, %v478_v30 }
 0x353   : > { %v458_v21 = vpop.xlane.xlu1 %457 }
 0x354   : > { %v463_v22 = vadd.f32 %v458_v21, %v453_v20 }
 0x356   : > { %466 = vst.msk [vmem:[#allocation5] sm:$0xff] %vm465_vm6, %v463_v22 }
 0x357   : > { %v462_v24 = vpop.xlane.xlu1 %461 }
 0x358   : > { %v464_v26 = vadd.f32 %v462_v24, %v454_v23 }
 0x35a   : > { %468 = vst.msk [vmem:[#allocation5 + $0x8] sm:$0x3f] %vm467_vm5, %v464_v26 }
 0x35c   : > { %v508_v31 = vpop.xlane.xlu1 %507 }
 0x35d   : > { %v510_v32 = vadd.f32 %v508_v31, %v487_v29 }
 0x35e   : > { %518 = sbr.rel (%p620_p9) target bundleno = 1102 (0x44e), region = 85 }
 0x35f   : > { %512 = vst.msk [vmem:[#allocation4 + $0x8] sm:$0x3f] %vm467_vm5, %v510_v32  ;;  %v505_v34 = vpop.xlane.xlu0 %504 }
 0x360   : > { %v509_v35 = vadd.f32 %v505_v34, %v486_v33 }
 0x362   : > { %511 = vst.msk [vmem:[#allocation4] sm:$0xff] %vm465_vm6, %v509_v35 }
 0x363   : > { %v519_v39 = vld [vmem:[#allocation3] sm:$0xff]  ;;  %v520_v41 = vld [vmem:[#allocation3 + $0x8] sm:$0x3f]  ;;  %vm548_vm9 = vcmask 0  }
 0x364   : > { %v529_v44 = vld [vmem:[#allocation5] sm:$0xff]  ;;  %v530_v46 = vld [vmem:[#allocation5 + $0x8] sm:$0x3f] }
 0x366   : > { %v522_v37 = vld [vmem:[#allocation4 + $0x8] sm:$0x3f] }
 0x369   : > { %v521_v36 = vld [vmem:[#allocation4] sm:$0xff] }
 0x36a   : > { %714 = vlog2.f32 %v521_v36 }
 0x36b   : > { %716 = vlog2.f32 %v522_v37 }
 0x377   : > { %v715_v38 = vpop.eup %714 }
 0x378   : > { %v717_v40 = vpop.eup %716  ;;  %v524_v42 = vmul.f32 0.6931472, %v715_v38 }
 0x379   : > { %v526_v43 = vmul.f32 0.6931472, %v717_v40 }
 0x37a   : > { %v527_v45 = vadd.f32 %v524_v42, %v519_v39 }
 0x37b   : > { %v528_v47 = vadd.f32 %v526_v43, %v520_v41 }
 0x37c   : > { %v531_v48 = vsub.f32 %v527_v45, %v529_v44 }
 0x37d   : > { %v532_v49 = vsub.f32 %v528_v47, %v530_v46 }
 0x37e   : > { %v533_v50 = vsel %vm465_vm6, %v531_v48, 0.0 }
 0x37f   : > { %v534_v51 = vsel %vm467_vm5, %v532_v49, 0.0 }
 0x380   : > { %v535_v52 = vadd.f32 %v534_v51, %v533_v50 }
 0x382   : > { %536 = vadd.xlane.f32.xlu0 %v535_v52 }
 0x40b   : > { %v537_v53 = vpop.xlane.xlu0 %536 }
 0x40c   : > { %v538_v54 = vrot.slane %v537_v53, 4 }
 0x40e   : > { %v539_v55 = vadd.f32 %v538_v54, %v537_v53 }
 0x410   : > { %v540_v56 = vrot.slane %v539_v55, 2 }
 0x412   : > { %v541_v57 = vadd.f32 %v540_v56, %v539_v55 }
 0x414   : > { %v542_v58 = vrot.slane %v541_v57, 1 }
 0x416   : > { %v543_v59 = vadd.f32 %v542_v58, %v541_v57 }
 0x418   : > { %654 = vpush %v543_v59 }
 0x449   : > { %s655_s21 = spop %654 }
 0x44a   : > { %v545_v60 = vstv %s655_s21 }
 0x44b   : > { %v547_v61 = vmul.f32 0.071428575, %v545_v60 }
 0x44d   : > { %549 = vst.msk [vmem:[#allocation7] sm:$0x1] %vm548_vm9, %v547_v61 }
 0x44e PF: > { %p660_p10 = scmp.eq.s32.totalorder %s817_s18, 3  ;;  %s775_s23 = smov [#allocation7]  }
 0x44f   : > { %s557_s24 = sshll.u32 %s775_s23, 4  ;;  %s558_s24 = int_to_ptr.vmem [resolvable:$true] %s557_s24 }
 0x450   : > { %s718_s25 = scalar_lea.vmem %s558_s24, 16  ;;  %s724_s26 = scalar_lea.vmem %s558_s24, 32 }
 0x451   : > { %p719_p11 = scmp.ne.s32.totalorder %s558_s24, %s718_s25  ;;  %p725_p0 = scmp.lt.s32.totalorder %s558_s24, %s558_s24 }
 0x452   : > { %p726_p1 = scmp.lt.s32.totalorder %s724_s26, %s718_s25 }
 0x453   : > { %p720_p12 = pnand %p719_p11, %p660_p10 }
 0x454   : > { %p727_p2 = por %p726_p1, %p725_p0 }
 0x455   : > { %p721_p13 = pneg %p720_p12 }
 0x457   : > { %p728_p3 = pnand %p727_p2, %p721_p13 }
 0x459   : > { %731 = shalt.err (!%p728_p3)
}
 0x45a   : > { %657 = dma.vmem_to_hbm [thread:$0]  (%p660_p10), %s558_s24, 16, %s923_s4, [#allocation8]  }
 0x45b   : > { %755 = dma.done.wait (%p660_p10), [#allocation8], 16  }
 0x45c   : > { %757 = vsyncadd (%p660_p10), [#allocation8], 4294967280 }
 0x45d PF: > { %p12_p4 = scmp.ge.s32.totalorder %s820_s19, 6   ;;  %s924_s15 = smov %s764_s16 }
 0x45e   : > { %s925_s16 = smov %s829_s22  ;;  %s926_s17 = smov %s820_s19 }
 0x45f   :  { %14 = sbr.rel (!%p12_p4) target bundleno = 2 (0x2), region = 117 }
 0x464   :  { %570 = vsyncpa [#allocation8], 1 }
 0x465   :  { %572 = vsyncpa [#allocation8 + $0x1], 1 }

</bundles_post_ra>
